<compile_context>
chip_gen: v6e
topology: v6e:2x2x1
jax: 0.10.0
libtpu: 0.0.40
codegen_flags: <defaults>
</compile_context>

<pallas_src>
import math

import jax
import jax.numpy as jnp
import numpy as np
from jax import lax
from jax.experimental import pallas as pl
from jax.experimental.pallas import tpu as pltpu

LIMIT_A = -0.1
LIMIT_B = 1.1
_SPAN = LIMIT_B - LIMIT_A

# Tile ceilings. Worst case VMEM (fused path, 512^3 tiles, double-buffered inputs):
# x 2*0.5 MiB + w 2*1 MiB + qz 2*1 MiB + out 2*1 MiB + acc 1 MiB ~= 8 MiB, far under
# the 48 MiB budget and under v7x's 64 MiB physical VMEM.
_MAX_TM = 512
_MAX_TN = 512
_MAX_TK = 512
_VMEM_LIMIT_BYTES = 48 * 1024 * 1024


def _round_up(x, m):
    return (x + m - 1) // m * m


def _choose_tile(dim, align, max_tile):
    """Return (tile, padded): tile % align == 0, tile divides padded, padded minimal."""
    padded = _round_up(dim, align)
    if padded <= max_tile:
        return padded, padded
    tile = (max_tile // align) * align
    while padded % tile:
        tile -= align
    return tile, padded


def _pad2(a, rows, cols):
    pr, pc = rows - a.shape[0], cols - a.shape[1]
    if pr == 0 and pc == 0:
        return a
    return jnp.pad(a, ((0, pr), (0, pc)))


def _hard_sigmoid_gate(qz):
    # hardtanh(sigmoid(qz) * span + limit_a, 0, 1)
    return jnp.clip(jax.nn.sigmoid(qz) * _SPAN + LIMIT_A, 0.0, 1.0)


# ---------------------------------------------------------------------------
# Prologue (multi-M-tile path): gate the weights once and emit them transposed
# (I, O) in bf16 so the main loop does a natural (M,K)x(K,N) MXU contraction.
# ---------------------------------------------------------------------------
def _gate_weight_t_kernel(w_ref, qz_ref, wzt_ref):
    z = _hard_sigmoid_gate(qz_ref[...])
    wzt_ref[...] = (w_ref[...] * z).T.astype(wzt_ref.dtype)


# ---------------------------------------------------------------------------
# Main matmul (multi-M-tile path): grid (B/tm, O/tn, I/tk), f32 VMEM accumulator,
# pl.when init/finalize; the (pre-gated) bias is added only in the last K step.
# ---------------------------------------------------------------------------
def _matmul_bias_kernel(x_ref, wt_ref, b_ref, o_ref, acc_ref):
    k = pl.program_id(2)

    @pl.when(k == 0)
    def _():
        acc_ref[...] = jnp.zeros_like(acc_ref)

    acc_ref[...] += jnp.dot(
        x_ref[...], wt_ref[...], preferred_element_type=jnp.float32
    )

    @pl.when(k == pl.num_programs(2) - 1)
    def _():
        o_ref[...] = (acc_ref[...] + b_ref[...]).astype(o_ref.dtype)


# ---------------------------------------------------------------------------
# Fused path (single M tile): each weight tile is visited exactly once, so the
# sigmoid/clip gate is computed in-loop (8 B HBM per weight element vs 12 B for
# a separate gate pass + reread).
# ---------------------------------------------------------------------------
def _fused_gate_matmul_kernel(x_ref, w_ref, qz_ref, b_ref, o_ref, acc_ref):
    k = pl.program_id(2)

    @pl.when(k == 0)
    def _():
        acc_ref[...] = jnp.zeros_like(acc_ref)

    z = _hard_sigmoid_gate(qz_ref[...])
    w_eff = (w_ref[...] * z).astype(jnp.bfloat16)
    # (tm, tk) . (tn, tk) contracting the shared I axis -> (tm, tn).
    acc_ref[...] += lax.dot_general(
        x_ref[...],
        w_eff,
        dimension_numbers=(((1,), (1,)), ((), ())),
        preferred_element_type=jnp.float32,
    )

    @pl.when(k == pl.num_programs(2) - 1)
    def _():
        o_ref[...] = (acc_ref[...] + b_ref[...]).astype(o_ref.dtype)


def l0_dense_bias_corr_forward(
    x, weight, bias, qz_loga, *, max_tm=_MAX_TM, max_tn=_MAX_TN, max_tk=_MAX_TK
):
    """x: (B, I), weight: (O, I), bias: (O,), qz_loga: (O, I + 1) -> (B, O)."""
    B, I = x.shape
    O, _ = weight.shape

    # tm aligned to 16: bf16 LHS min sublane tile is (16, 128).
    tm, B_pad = _choose_tile(B, 16, max_tm)
    tn, O_pad = _choose_tile(O, 128, max_tn)   # lane-dense output tiles
    tk, I_pad = _choose_tile(I, 128, max_tk)

    grid_m = B_pad // tm

    # v7x megacore: with a single M tile, keep >= 2 output tiles so the second
    # TensorCore has parallel work. Only re-streams the (small) x tile.
    if grid_m == 1 and O_pad // tn < 2 and O_pad // 128 >= 2:
        tn = max(d for d in range(128, O_pad // 2 + 1, 128) if O_pad % d == 0)

    f32 = jnp.float32
    # bf16 x in the wrapper: halves the re-fetched x stream, no per-step cast.
    x_p = _pad2(x.astype(jnp.bfloat16), B_pad, I_pad)
    w_p = _pad2(weight.astype(f32), O_pad, I_pad)
    qz_w = _pad2(qz_loga[:, :I].astype(f32), O_pad, I_pad)

    # Bias gate precomputed on O elements (tiny) -> a single (1, O_pad) row.
    b_eff = bias.astype(f32) * _hard_sigmoid_gate(qz_loga[:, I].astype(f32))
    b_eff = _pad2(b_eff.reshape(1, O), 1, O_pad)

    cparams3 = pltpu.CompilerParams(
        dimension_semantics=("parallel", "parallel", "arbitrary"),
        vmem_limit_bytes=_VMEM_LIMIT_BYTES,
    )

    if grid_m == 1:
        out_p = pl.pallas_call(
            _fused_gate_matmul_kernel,
            out_shape=jax.ShapeDtypeStruct((B_pad, O_pad), x.dtype),
            grid_spec=pltpu.PrefetchScalarGridSpec(
                num_scalar_prefetch=0,
                grid=(grid_m, O_pad // tn, I_pad // tk),
                in_specs=[
                    pl.BlockSpec((tm, tk), lambda i, j, k: (i, k)),   # x (bf16)
                    pl.BlockSpec((tn, tk), lambda i, j, k: (j, k)),   # weight (f32)
                    pl.BlockSpec((tn, tk), lambda i, j, k: (j, k)),   # gate logits
                    pl.BlockSpec((1, tn), lambda i, j, k: (0, j)),    # pre-gated bias
                ],
                out_specs=pl.BlockSpec((tm, tn), lambda i, j, k: (i, j)),
                scratch_shapes=[pltpu.VMEM((tm, tn), jnp.float32)],
            ),
            compiler_params=cparams3,
        )(x_p, w_p, qz_w, b_eff)
    else:
        # Prologue: gated + transposed bf16 weights, computed once per call.
        w_eff_t = pl.pallas_call(
            _gate_weight_t_kernel,
            out_shape=jax.ShapeDtypeStruct((I_pad, O_pad), jnp.bfloat16),
            grid_spec=pltpu.PrefetchScalarGridSpec(
                num_scalar_prefetch=0,
                grid=(O_pad // tn, I_pad // tk),
                in_specs=[
                    pl.BlockSpec((tn, tk), lambda o, i: (o, i)),
                    pl.BlockSpec((tn, tk), lambda o, i: (o, i)),
                ],
                out_specs=pl.BlockSpec((tk, tn), lambda o, i: (i, o)),
            ),
            compiler_params=pltpu.CompilerParams(
                dimension_semantics=("parallel", "parallel"),
                vmem_limit_bytes=_VMEM_LIMIT_BYTES,
            ),
        )(w_p, qz_w)

        out_p = pl.pallas_call(
            _matmul_bias_kernel,
            out_shape=jax.ShapeDtypeStruct((B_pad, O_pad), x.dtype),
            grid_spec=pltpu.PrefetchScalarGridSpec(
                num_scalar_prefetch=0,
                grid=(grid_m, O_pad // tn, I_pad // tk),
                in_specs=[
                    pl.BlockSpec((tm, tk), lambda i, j, k: (i, k)),   # x (bf16)
                    pl.BlockSpec((tk, tn), lambda i, j, k: (k, j)),   # w_eff^T (bf16)
                    pl.BlockSpec((1, tn), lambda i, j, k: (0, j)),    # pre-gated bias
                ],
                out_specs=pl.BlockSpec((tm, tn), lambda i, j, k: (i, j)),
                scratch_shapes=[pltpu.VMEM((tm, tn), jnp.float32)],
            ),
            compiler_params=cparams3,
        )(x_p, w_eff_t, b_eff)

    if B_pad == B and O_pad == O:
        return out_p
    return out_p[:B, :O]


def _reference_forward(x, weight, bias, qz_loga):
    z = jnp.clip(jax.nn.sigmoid(qz_loga) * _SPAN + LIMIT_A, 0.0, 1.0)
    w_eff = weight * z[:, :-1]
    b_eff = bias * z[:, -1]
    return x @ w_eff.T + b_eff


def _make_inputs(key, B, IN_F, OUT_F, droprate=0.5):
    k_x, k_w, k_b, k_q = jax.random.split(key, 4)
    # Deterministic synthetic init mirroring reset_parameters():
    #  - weight ~ kaiming_uniform(mode='fan_out'): bound = sqrt(2) * sqrt(3 / fan_out)
    #  - qz_loga ~ Normal(log(1-droprate) - log(droprate), 0.01)
    #  - bias: nonzero deterministic values (module inits zeros; nonzero exercises the gate)
    bound = math.sqrt(2.0) * math.sqrt(3.0 / OUT_F)
    weight = jax.random.uniform(
        k_w, (OUT_F, IN_F), dtype=jnp.float32, minval=-bound, maxval=bound
    )
    bias = jax.random.uniform(k_b, (OUT_F,), dtype=jnp.float32, minval=-0.1, maxval=0.1)
    qz_mean = math.log(1.0 - droprate) - math.log(droprate)
    qz_loga = qz_mean + 0.01 * jax.random.normal(
        k_q, (OUT_F, IN_F + 1), dtype=jnp.float32
    )
    x = jax.random.normal(k_x, (B, IN_F), dtype=jnp.float32)
    return x, weight, bias, qz_loga


if __name__ == "__main__":
    key = jax.random.PRNGKey(0)
    k1, k2 = jax.random.split(key)

    # Case 1: small batch -> single M tile -> fused gate + matmul path.
    #         Exercises the K loop (I = 2 * tk) and a non-power-of-two O (384).
    x1, w1, b1, q1 = _make_inputs(k1, B=8, IN_F=1024, OUT_F=384)
    out1 = jax.block_until_ready(l0_dense_bias_corr_forward(x1, w1, b1, q1))
    assert out1.shape == (8, 384)
    ref1 = _reference_forward(x1, w1, b1, q1)
    # bf16 MXU operands with f32 accumulation -> tolerance sized for bf16 rounding.
    np.testing.assert_allclose(np.asarray(out1), np.asarray(ref1), rtol=3e-2, atol=3e-2)

    # Case 2: force multiple M tiles (max_tm=64, B=128) -> prologue (gate + transpose
    #         once) + K-major main matmul path.
    x2, w2, b2, q2 = _make_inputs(k2, B=128, IN_F=512, OUT_F=384)
    out2 = jax.block_until_ready(
        l0_dense_bias_corr_forward(x2, w2, b2, q2, max_tm=64)
    )
    assert out2.shape == (128, 384)
    ref2 = _reference_forward(x2, w2, b2, q2)
    np.testing.assert_allclose(np.asarray(out2), np.asarray(ref2), rtol=3e-2, atol=3e-2)

    print("KERNEL_OK")
</pallas_src>

<mosaic_0001>
module attributes {stable_mosaic.version = 11 : i64} {
  func.func @_fused_gate_matmul_kernel(%arg0: i32, %arg1: i32, %arg2: i32, %arg3: memref<16x512xbf16, #tpu.memory_space<vmem>>, %arg4: memref<128x512xf32, #tpu.memory_space<vmem>>, %arg5: memref<128x512xf32, #tpu.memory_space<vmem>>, %arg6: memref<1x128xf32, #tpu.memory_space<vmem>>, %arg7: memref<16x128xf32, #tpu.memory_space<vmem>>, %arg8: memref<16x128xf32, #tpu.memory_space<vmem>>) attributes {dimension_semantics = [#tpu.dimension_semantics<parallel>, #tpu.dimension_semantics<parallel>, #tpu.dimension_semantics<arbitrary>], iteration_bounds = array<i64: 1, 3, 2>, scalar_prefetch = 0 : i64, scratch_operands = 1 : i64, tpu.core_type = #tpu.core_type<tc>, window_params = [{transform_indices = @transform_0, window_bounds = array<i64: 16, 512>}, {transform_indices = @transform_1, window_bounds = array<i64: 128, 512>}, {transform_indices = @transform_2, window_bounds = array<i64: 128, 512>}, {transform_indices = @transform_3, window_bounds = array<i64: 1, 128>}, {transform_indices = @transform_4, window_bounds = array<i64: 16, 128>}]} {
    %c0_i32 = arith.constant 0 : i32
    %0 = arith.cmpi eq, %arg2, %c0_i32 : i32
    %1 = arith.extui %0 : i1 to i32
    %c0_i32_0 = arith.constant 0 : i32
    %2 = arith.cmpi ne, %1, %c0_i32_0 : i32
    scf.if %2 {
      %cst_16 = arith.constant 0.000000e+00 : f32
      %28 = vector.broadcast %cst_16 : f32 to vector<16x128xf32>
      %c0_17 = arith.constant 0 : index
      %c0_18 = arith.constant 0 : index
      %29 = vector.load %arg8[%c0_17, %c0_18] : memref<16x128xf32, #tpu.memory_space<vmem>>, vector<16x128xf32>
      tpu.vector_store %arg8[%c0_17, %c0_18], %28 {strides = array<i32>} : memref<16x128xf32, #tpu.memory_space<vmem>>, vector<16x128xf32>,
    } else {
    }
    %c0 = arith.constant 0 : index
    %c0_1 = arith.constant 0 : index
    %3 = vector.load %arg5[%c0, %c0_1] : memref<128x512xf32, #tpu.memory_space<vmem>>, vector<128x512xf32>
    %4 = arith.negf %3 : vector<128x512xf32>
    %5 = math.exp %4 : vector<128x512xf32>
    %cst = arith.constant 1.000000e+00 : f32
    %6 = vector.broadcast %cst : f32 to vector<128x512xf32>
    %7 = arith.addf %6, %5 : vector<128x512xf32>
    %8 = arith.divf %6, %7 : vector<128x512xf32>
    %cst_2 = arith.constant 1.200000e+00 : f32
    %9 = vector.broadcast %cst_2 : f32 to vector<128x512xf32>
    %10 = arith.mulf %8, %9 : vector<128x512xf32>
    %cst_3 = arith.constant -1.000000e-01 : f32
    %11 = vector.broadcast %cst_3 : f32 to vector<128x512xf32>
    %12 = arith.addf %10, %11 : vector<128x512xf32>
    %cst_4 = arith.constant 0.000000e+00 : f32
    %cst_5 = arith.constant 1.000000e+00 : f32
    %13 = vector.broadcast %cst_4 : f32 to vector<128x512xf32>
    %14 = arith.maximumf %13, %12 : vector<128x512xf32>
    %15 = vector.broadcast %cst_5 : f32 to vector<128x512xf32>
    %16 = arith.minimumf %15, %14 : vector<128x512xf32>
    %c0_6 = arith.constant 0 : index
    %c0_7 = arith.constant 0 : index
    %17 = vector.load %arg4[%c0_6, %c0_7] : memref<128x512xf32, #tpu.memory_space<vmem>>, vector<128x512xf32>
    %18 = arith.mulf %17, %16 : vector<128x512xf32>
    %19 = arith.truncf %18 : vector<128x512xf32> to vector<128x512xbf16>
    %c0_8 = arith.constant 0 : index
    %c0_9 = arith.constant 0 : index
    %20 = vector.load %arg8[%c0_8, %c0_9] : memref<16x128xf32, #tpu.memory_space<vmem>>, vector<16x128xf32>
    %c0_10 = arith.constant 0 : index
    %c0_11 = arith.constant 0 : index
    %21 = vector.load %arg3[%c0_10, %c0_11] : memref<16x512xbf16, #tpu.memory_space<vmem>>, vector<16x512xbf16>
    %cst_12 = arith.constant dense<0.000000e+00> : vector<16x128xf32>
    %22 = tpu.matmul %21, %19, %cst_12 {dimension_numbers = #tpu.dot_dimension_numbers<[1], [1], [0], [0], [0, 0, 1, 0], [], []>} : vector<16x512xbf16>, vector<128x512xbf16>, vector<16x128xf32> -> vector<16x128xf32>
    %23 = arith.addf %20, %22 : vector<16x128xf32>
    %c0_13 = arith.constant 0 : index
    %c0_14 = arith.constant 0 : index
    %24 = vector.load %arg8[%c0_13, %c0_14] : memref<16x128xf32, #tpu.memory_space<vmem>>, vector<16x128xf32>
    tpu.vector_store %arg8[%c0_13, %c0_14], %23 {strides = array<i32>} : memref<16x128xf32, #tpu.memory_space<vmem>>, vector<16x128xf32>,
    %c1_i32 = arith.constant 1 : i32
    %25 = arith.cmpi eq, %arg2, %c1_i32 : i32
    %26 = arith.extui %25 : i1 to i32
    %c0_i32_15 = arith.constant 0 : i32
    %27 = arith.cmpi ne, %26, %c0_i32_15 : i32
    scf.if %27 {
      %c0_16 = arith.constant 0 : index
      %c0_17 = arith.constant 0 : index
      %28 = vector.load %arg8[%c0_16, %c0_17] : memref<16x128xf32, #tpu.memory_space<vmem>>, vector<16x128xf32>
      %c0_18 = arith.constant 0 : index
      %c0_19 = arith.constant 0 : index
      %29 = vector.load %arg6[%c0_18, %c0_19] : memref<1x128xf32, #tpu.memory_space<vmem>>, vector<1x128xf32>
      %30 = vector.broadcast %29 : vector<1x128xf32> to vector<16x128xf32>
      %31 = arith.addf %28, %30 : vector<16x128xf32>
      %c0_20 = arith.constant 0 : index
      %c0_21 = arith.constant 0 : index
      %32 = vector.load %arg7[%c0_20, %c0_21] : memref<16x128xf32, #tpu.memory_space<vmem>>, vector<16x128xf32>
      tpu.vector_store %arg7[%c0_20, %c0_21], %31 {strides = array<i32>} : memref<16x128xf32, #tpu.memory_space<vmem>>, vector<16x128xf32>,
    } else {
    }
    return
  }
  func.func @transform_0(%arg0: i32, %arg1: i32, %arg2: i32) -> (i32, i32) {
    %c0_i32 = arith.constant 0 : i32
    return %arg0, %arg2 : i32, i32
  }
  func.func @transform_1(%arg0: i32, %arg1: i32, %arg2: i32) -> (i32, i32) {
    %c0_i32 = arith.constant 0 : i32
    return %arg1, %arg2 : i32, i32
  }
  func.func @transform_2(%arg0: i32, %arg1: i32, %arg2: i32) -> (i32, i32) {
    %c0_i32 = arith.constant 0 : i32
    return %arg1, %arg2 : i32, i32
  }
  func.func @transform_3(%arg0: i32, %arg1: i32, %arg2: i32) -> (i32, i32) {
    %c0_i32 = arith.constant 0 : i32
    %c0_i32_0 = arith.constant 0 : i32
    return %c0_i32, %arg1 : i32, i32
  }
  func.func @transform_4(%arg0: i32, %arg1: i32, %arg2: i32) -> (i32, i32) {
    %c0_i32 = arith.constant 0 : i32
    return %arg0, %arg1 : i32, i32
  }
}

</mosaic_0001>

<bundles_post_ra>
// kernel: tpu_custom_call.1
= control target key start
LH: loop header
LB: loop body
LE: loop exit
PB: predicated region body
PF: predicated region fallthrough
CT: control target
= control target key end

     0   :  { %s2900_s0 = inlined_call_operand.hbm [shape: bf16[16,1024], index: 0, kind: input, shape index: {}]   ;;  %s2901_s1 = inlined_call_operand.hbm [shape: f32[384,1024], index: 1, kind: input, shape index: {}]   ;;  %s2902_s2 = inlined_call_operand.hbm [shape: f32[384,1024], index: 2, kind: input, shape index: {}]   ;;  %s2903_s3 = inlined_call_operand.hbm [shape: f32[1,384], index: 3, kind: input, shape index: {}]   ;;  %s2904_s4 = inlined_call_operand.hbm [shape: f32[16,384], index: 4, kind: output, shape index: {}]  }
   0x1   :  { %2919 = sst [smem:[#allocation22_spill]] %s2900_s0 }
   0x2   :  { %2920 = sst [smem:[#allocation23_spill]] %s2901_s1 }
   0x3   :  { %2921 = sst [smem:[#allocation24_spill]] %s2902_s2 }
   0x4   :  { %2922 = sst [smem:[#allocation25_spill]] %s2903_s3 }
   0x5   :  { %2923 = sst [smem:[#allocation26_spill]] %s2904_s4 }
   0x6   :  { %9 = vsyncpa [#allocation4], 0 }
   0x7   :  { %11 = vsyncpa [#allocation4 + $0x1], 0 }
   0x8   :  { %12 = vsyncpa [#allocation7], 0 }
   0x9   :  { %14 = vsyncpa [#allocation7 + $0x1], 0 }
   0xa   :  { %15 = vsyncpa [#allocation10], 0 }
   0xb   :  { %17 = vsyncpa [#allocation10 + $0x1], 0 }
   0xc   :  { %18 = vsyncpa [#allocation5], 0 }
   0xd   :  { %20 = vsyncpa [#allocation5 + $0x1], 0  ;;  %s2365_s15 = smov 0   ;;  %s2367_s16 = smov 0  }
   0xe   :  { %s2369_s17 = smov 0   ;;  %s2371_s18 = smov 0  }
   0xf   :  { %s2373_s19 = smov 0   ;;  %s2375_s20 = smov 0  }
  0x10   :  { %s2377_s21 = smov 0   ;;  %s2379_s22 = smov 0  }
  0x11   :  { %s2381_s23 = smov 0   ;;  %s2383_s24 = smov 0  }
  0x12   :  { %s2385_s25 = smov 0   ;;  %s2387_s26 = smov 0  }
  0x13   :  { %s2389_s27 = smov 0   ;;  %s2391_s28 = smov 0  }
  0x14 LB: > { %2924 = sst [smem:[#allocation16_spill]] %s2308_s24  ;;  %s2905_s29 = sadd.s32 1, %s2316_s26  ;;  %s2324_s28 = sphi %s2391_s28, %s26_s28   ;;  %s2320_s27 = sphi %s2389_s27, %s2965_s27   ;;  %s2316_s26 = sphi %s2387_s26, %s2976_s26   ;;  %s2312_s25 = sphi %s2385_s25, %s2963_s25   ;;  %s2308_s24 = sphi %s2383_s24, %s2975_s24   ;;  %s2304_s23 = sphi %s2381_s23, %s2974_s23   ;;  %s2300_s22 = sphi %s2379_s22, %s2973_s22   ;;  %s2296_s21 = sphi %s2377_s21, %s2972_s21   ;;  %s2292_s20 = sphi %s2375_s20, %s2971_s20   ;;  %s2288_s19 = sphi %s2373_s19, %s2970_s19   ;;  %s2284_s18 = sphi %s2371_s18, %s2969_s18   ;;  %s2280_s17 = sphi %s2369_s17, %s2968_s17   ;;  %s2276_s16 = sphi %s2367_s16, %s2967_s16   ;;  %s2272_s15 = sphi %s2365_s15, %s2966_s15  }
  0x15   : > { %2925 = sst [smem:[#allocation17_spill]] %s2312_s25  ;;  %p2912_p0 = scmp.eq.s32.totalorder %s2324_s28, 0 }
  0x16   : > { %2926 = sst [smem:[#allocation18_spill]] %s2320_s27  ;;  %p2439_p1 = scmp.ge.s32.totalorder %s2905_s29, 2 }
  0x17   : > { %p89_p2 = scmp.ne.s32.totalorder %s2292_s20, %s2288_s19  ;;  %p2913_p4 = scmp.lt.s32.totalorder %s2324_s28, 6 }
  0x18   : > { %s225_s6 = sand.u32 1, %s2324_s28   ;;  %s227_s7 = sand.u32 1, %s2292_s20  }
  0x19   : > { %p91_p5 = por %p89_p2, %p2912_p0  ;;  %s2453_s8 = sshll.u32 %s227_s7, 9 }
  0x1a   : > { %s1556_s9 = sshll.u32 %s2316_s26, 2  ;;  %s1646_s10 = sshll.u32 %s2320_s27, 7 }
  0x1b   : > { %s229_s11 = scalar_lea.vmem [#allocation6], %s2453_s8  ;;  %s236_s13 = sadd.s32 %s1646_s10, %s1556_s9 }
  0x1c   : > { %s239_s12 = sshll.u32 %s229_s11, 4  ;;  %s1558_s14 = sshll.u32 %s236_s13, 7  ;;  %s240_s12 = int_to_ptr.vmem [resolvable:$true] %s239_s12 }
  0x1d   : > { %p2460_p6 = pnand %p2913_p4, %p91_p5  ;;  %s2929_s1 = sld [smem:[#allocation23_spill]] }
  0x1e   : > { %s2467_s25 = scalar_lea.sflag [#allocation7], %s225_s6  ;;  %s2073_s24 = scalar_lea.vmem %s240_s12, 8192 }
  0x1f   : > { %p2062_p7 = pneg %p2460_p6  ;;  %p2074_p8 = scmp.ne.s32.totalorder %s240_s12, %s2073_s24 }
  0x20   : > { %s2326_s9 = smov [#allocation6]  }
  0x21   : > { %p2076_p9 = pnand %p2074_p8, %p2062_p7  ;;  %s2078_s10 = sshll.u32 %s2326_s9, 4  ;;  %s2079_s10 = int_to_ptr.vmem [resolvable:$false] %s2078_s10 }
  0x22   : > { %s2080_s11 = scalar_lea.vmem %s2079_s10, 16384  ;;  %p2081_p11 = scmp.lt.s32.totalorder %s240_s12, %s2079_s10 }
  0x23   : > { %s238_s7 = scalar_lea.hbm %s2929_s1, %s1558_s14  ;;  %p2077_p10 = pneg %p2076_p9 }
  0x24   : > { %p2082_p12 = scmp.lt.s32.totalorder %s2080_s11, %s2073_s24 }
  0x26   : > { %p2083_p13 = por %p2082_p12, %p2081_p11 }
  0x28   : > { %p2084_p2 = pnand %p2083_p13, %p2077_p10 }
  0x2a   : > { %2087 = shalt.err (!%p2084_p2)
}
  0x2b   : > { %s2907_s4 = smov 1024   ;;  %s2909_s29 = smov 512  }
  0x2c   : > { %s2908_s6 = smov 32   ;;  %s2930_s2 = sld [smem:[#allocation24_spill]] }
  0x2d   : > { %1664 = dma.hbm_to_vmem [thread:$0]  (!%p2460_p6), %s238_s7, 8192, %s240_s12, %s2467_s25, %s2907_s4, %s2909_s29, %s2908_s6  }
  0x2e   : > { %s253_s10 = scalar_lea.vmem [#allocation8], %s2453_s8  ;;  %p1565_p5 = scmp.ge.s32.totalorder %s2324_s28, 1 }
  0x2f   : > { %s263_s11 = sshll.u32 %s253_s10, 4  ;;  %p288_p8 = scmp.lt.s32.totalorder %s2324_s28, 7  ;;  %s2487_s11 = int_to_ptr.vmem [resolvable:$true] %s263_s11 }
  0x30   : > { %p61_p10 = scmp.ne.s32.totalorder %s2304_s23, %s2300_s22  ;;  %p67_p11 = scmp.ne.s32.totalorder %s2300_s22, %s2296_s21 }
  0x31   : > { %p2490_p9 = pnand %p1565_p5, %p288_p8  ;;  %s201_s12 = sand.u32 1, %s2304_s23  }
  0x32   : > { %s2483_s9 = scalar_lea.hbm %s2930_s2, %s1558_s14  ;;  %s1645_s7 = sshll.u32 %s2316_s26, 8 }
  0x33   : > { %s2931_s1 = scalar_select %p2490_p9, 1, 0 }
  0x34   : > { %p63_p12 = por %p2912_p0, %p61_p10  ;;  %s1551_s24 = sshll.u32 %s201_s12, 5 }
  0x35   : > { %2932 = sst [smem:[#allocation19_spill]] %s2931_s1  ;;  %s205_s4 = scalar_lea.vmem [#allocation3], %s1551_s24 }
  0x36   : > { %s2933_s0 = sld [smem:[#allocation22_spill]]  ;;  %p2508_p13 = pnand %p2913_p4, %p63_p12 }
  0x37   : > { %s215_s6 = sshll.u32 %s205_s4, 4  ;;  %s202_s3 = scalar_lea.sflag [#allocation4], %s201_s12  ;;  %s216_s6 = int_to_ptr.vmem [resolvable:$true] %s215_s6 }
  0x38   : > { %p2090_p2 = pneg %p2508_p13  ;;  %s2101_s29 = scalar_lea.vmem %s216_s6, 512 }
  0x39   : > { %p2102_p5 = scmp.ne.s32.totalorder %s216_s6, %s2101_s29  ;;  %s2330_s2 = smov [#allocation3]  }
  0x3a   : > { %s2106_s1 = sshll.u32 %s2330_s2, 4  ;;  %s2107_s1 = int_to_ptr.vmem [resolvable:$false] %s2106_s1 }
  0x3b   : > { %p2104_p8 = pnand %p2102_p5, %p2090_p2  ;;  %p2109_p0 = scmp.lt.s32.totalorder %s216_s6, %s2107_s1 }
  0x3c   : > { %s214_s8 = scalar_lea.hbm %s2933_s0, %s1645_s7  ;;  %s2108_s7 = scalar_lea.vmem %s2107_s1, 1024 }
  0x3d   : > { %p2105_p10 = pneg %p2104_p8  ;;  %p2110_p12 = scmp.lt.s32.totalorder %s2108_s7, %s2101_s29 }
  0x3f   : > { %p2111_p4 = por %p2110_p12, %p2109_p0 }
  0x41   : > { %p2112_p3 = pnand %p2111_p4, %p2105_p10 }
  0x43   : > { %2115 = shalt.err (!%p2112_p3)
}
  0x44   : > { %s2331_s14 = smov 256   ;;  %s2332_s4 = smov 16  }
  0x45   : > { %s2935_s12 = smov 512   ;;  %s2129_s24 = scalar_lea.vmem %s2487_s11, 8192 }
  0x46   : > { %1661 = dma.hbm_to_vmem [thread:$0]  (!%p2508_p13), %s214_s8, 512, %s216_s6, %s202_s3, %s2935_s12, %s2331_s14, %s2332_s4  }
  0x47   : > { %p2130_p2 = scmp.ne.s32.totalorder %s2487_s11, %s2129_s24  ;;  %s2333_s1 = smov [#allocation8]  }
  0x48   : > { %s2134_s2 = sshll.u32 %s2333_s1, 4  ;;  %s2135_s2 = int_to_ptr.vmem [resolvable:$false] %s2134_s2 }
  0x49   : > { %p2132_p5 = pnand %p2130_p2, %p2062_p7  ;;  %s2136_s29 = scalar_lea.vmem %s2135_s2, 16384 }
  0x4a   : > { %p2137_p0 = scmp.lt.s32.totalorder %s2487_s11, %s2135_s2  ;;  %p2138_p3 = scmp.lt.s32.totalorder %s2136_s29, %s2129_s24 }
  0x4b   : > { %p2133_p8 = pneg %p2132_p5 }
  0x4c   : > { %p2139_p4 = por %p2138_p3, %p2137_p0 }
  0x4e   : > { %p2140_p10 = pnand %p2139_p4, %p2133_p8 }
  0x50   : > { %2143 = shalt.err (!%p2140_p10)
}
  0x51   : > { %s2936_s13 = smov 32   ;;  %s2937_s3 = smov 1024  }
  0x52   : > { %1667 = dma.hbm_to_vmem [thread:$0]  (!%p2460_p6), %s2483_s9, 8192, %s2487_s11, %s2467_s25, %s2937_s3, %s2935_s12, %s2936_s13  }
  0x53   : > { %s2532_s5 = sadd.s32 4294967295, %s2324_s28   ;;  %s1548_s6 = sadd.s32 4294967294, %s2324_s28  }
  0x54   : > { %s41_s8 = sadd.s32 1, %s2320_s27  ;;  %s2938_s10 = sadd.s32 1, %s2316_s26 }
  0x55   : > { %s2978_s10 = smov (%p2439_p1, %s2938_s10), 0  ;;  %s2980_s8 = smov (!%p2439_p1, %s41_s8), %s2320_s27 }
  0x56   : > { %2939 = sst [smem:[#allocation20_spill]] %s2978_s10  ;;  %s50_s25 = ssub.s32 %s2316_s26, %s2978_s10 }
  0x57   : > { %p68_p6 = scmp.eq.s32.totalorder %s2532_s5, 0  ;;  %p43_p7 = scmp.ge.s32.totalorder %s2980_s8, 3 }
  0x58   : > { %p52_p13 = scmp.eq.s32.totalorder %s50_s25, 0  ;;  %p2941_p2 = scmp.ne.s32.totalorder %s2288_s19, %s2284_s18 }
  0x59   : > { %p2553_p12 = por %p68_p6, %p67_p11  ;;  %s2982_s8 = smov (%p43_p7, %s2980_s8), 0 }
  0x5a   : > { %p2562_p1 = por %p2941_p2, %p68_p6  ;;  %2943 = sst [smem:[#allocation21_spill]] %s2982_s8 }
  0x5b   : > { %s2944_s11 = sadd.s32 1, %s2304_s23  ;;  %s77_s21 = ssub.s32 %s2320_s27, %s2982_s8 }
  0x5c   : > { %s2571_s7 = scalar_select %p52_p13, %s2304_s23, %s2944_s11  }
  0x5d   : > { %s136_s14 = sadd.s32 1, %s2280_s17  ;;  %s79_s4 = sor.u32 %s77_s21, %s50_s25 }
  0x5e   : > { %p134_p11 = scmp.eq.s32.totalorder %s77_s21, 0  ;;  %p80_p5 = scmp.eq.s32.totalorder %s79_s4, 0 }
  0x5f   : > { %p143_p8 = scmp.ne.s32.totalorder %s2280_s17, %s2276_s16  ;;  %s2945_s12 = sadd.s32 1, %s2292_s20 }
  0x60   : > { %s2579_s18 = scalar_select %p134_p11, %s2280_s17, %s136_s14  }
  0x61   : > { %s2584_s24 = scalar_select %p80_p5, %s2292_s20, %s2945_s12  }
  0x62   : > { %p2946_p0 = scmp.eq.s32.totalorder %s2324_s28, 0  ;;  %p149_p4 = scmp.ne.s32.totalorder %s2276_s16, %s2272_s15 }
  0x63   : > { %p175_p10 = scmp.eq.s32.totalorder %s2532_s5, 5  ;;  %p181_p7 = scmp.eq.s32.totalorder %s1548_s6, 5 }
  0x64   : > { %p2588_p3 = por %p143_p8, %p2946_p0  ;;  %p2597_p13 = por %p149_p4, %p68_p6 }
  0x65   : > { %s273_s29 = sand.u32 1, %s2280_s17   ;;  %p2602_p2 = por %p175_p10, %p143_p8 }
  0x66   : > { %s2948_s2 = scalar_select %p2597_p13, 1, 0 }
  0x67   : > { %s2949_s13 = scalar_select %p2602_p2, 1, 0 }
  0x68   : > { %p2606_p11 = por %p181_p7, %p149_p4  ;;  %s1564_s25 = sshll.u32 %s2320_s27, 4 }
  0x69   : > { %s276_s11 = scalar_lea.vmem [#allocation9], %s273_s29  ;;  %s2951_s6 = sld [smem:[#allocation25_spill]] }
  0x6a   : > { %s2950_s3 = scalar_select %p2606_p11, 1, 0 }
  0x6b   : > { %s283_s21 = sshll.u32 %s276_s11, 4  ;;  %p2952_p6 = scmp.lt.s32.totalorder %s2324_s28, 6  ;;  %s284_s21 = int_to_ptr.vmem [resolvable:$true] %s283_s21 }
  0x6c   : > { %s274_s8 = scalar_lea.sflag [#allocation10], %s273_s29  ;;  %s2157_s10 = scalar_lea.vmem %s284_s21, 16 }
  0x6d   : > { %p2618_p5 = pnand %p2952_p6, %p2588_p3  ;;  %p2158_p0 = scmp.ne.s32.totalorder %s284_s21, %s2157_s10 }
  0x6e   : > { %s2334_s11 = smov [#allocation9]  }
  0x6f   : > { %s281_s12 = scalar_lea.hbm %s2951_s6, %s1564_s25  ;;  %p2146_p8 = pneg %p2618_p5 }
  0x70   : > { %s2162_s27 = sshll.u32 %s2334_s11, 4  ;;  %s2163_s27 = int_to_ptr.vmem [resolvable:$false] %s2162_s27 }
  0x71   : > { %p2160_p4 = pnand %p2158_p0, %p2146_p8  ;;  %s2164_s14 = scalar_lea.vmem %s2163_s27, 32 }
  0x72   : > { %p2165_p7 = scmp.lt.s32.totalorder %s284_s21, %s2163_s27  ;;  %p2166_p11 = scmp.lt.s32.totalorder %s2164_s14, %s2157_s10 }
  0x73   : > { %p2161_p10 = pneg %p2160_p4 }
  0x74   : > { %p2167_p2 = por %p2166_p11, %p2165_p7 }
  0x76   : > { %p2168_p13 = pnand %p2167_p2, %p2161_p10 }
  0x78   : > { %2171 = shalt.err (!%p2168_p13)
}
  0x79   : > { %1670 = dma.hbm_to_vmem [thread:$0]  (!%p2618_p5), %s281_s12, 16, %s284_s21, %s274_s8  }
  0x7a   : > { %292 = sbr.rel (%p2490_p9) target bundleno = 620 (0x26c), region = 36  ;;  %s294_s29 = sand.u32 (!%p2490_p9), 1, %s2300_s22  }
  0x7b   : > { %s1566_s25 = sshll.u32 (!%p2490_p9), %s294_s29, 5  ;;  %s295_s4 = scalar_lea.sflag (!%p2490_p9), [#allocation4], %s294_s29 }
  0x7c   : > { %s2629_s6 = scalar_lea.vmem (!%p2490_p9), [#allocation3], %s1566_s25 }
  0x7f   : > { %2255 = dma.done.wait (%p2553_p12), %s295_s4, 512  }
  0x80   : > { %2257 = vsyncadd (%p2553_p12), %s295_s4, 4294966784  ;;  %s303_s0 = sand.u32 1, %s2532_s5   ;;  %s305_s27 = sand.u32 1, %s2288_s19  }
  0x81   : > { %s1567_s8 = sshll.u32 %s305_s27, 9  ;;  %s304_s10 = scalar_lea.sflag [#allocation7], %s303_s0 }
  0x82   : > { %s2637_s21 = scalar_lea.vmem [#allocation6], %s1567_s8 }
  0x83   : > { %2259 = dma.done.wait (%p2562_p1), %s304_s10, 16384  }
  0x84   : > { %2261 = vsyncadd (%p2562_p1), %s304_s10, 4294950912  ;;  %s2644_s12 = sand.u32 1, %s2276_s16   ;;  %s2646_s9 = scalar_lea.vmem [#allocation8], %s1567_s8 }
  0x85   : > { %s322_s11 = scalar_lea.sflag [#allocation10], %s2644_s12  ;;  %s324_s5 = scalar_lea.vmem [#allocation9], %s2644_s12 }
  0x86   : > { %p2955_p9 = scmp.ne.s32.totalorder %s2948_s2, 0 }
  0x88   : > { %2263 = dma.done.wait (%p2955_p9), %s322_s11, 16  }
  0x89   : > { %2265 = vsyncadd (%p2955_p9), %s322_s11, 4294967280  ;;  %s1569_s14 = sshll.u32 %s2644_s12, 4  ;;  %s2956_s30 = sld [smem:[#allocation16_spill]] }
  0x8a   : > { %s2655_s1 = scalar_lea.vmem [#allocation11], %s1569_s14 }
  0x8f   : > { %p1570_p12 = scmp.ne.s32.totalorder %s2956_s30, 0 }
  0x91   : > { %374 = sbr.rel (%p1570_p12) target bundleno = 152 (0x98), region = 56 }
  0x96   : > { %v2335_v0 = vmov 0.0  }
  0x97   : > { %375 = vst [vmem:[#allocation2] sm:$0xff] %v2335_v0  ;;  %376 = vst [vmem:[#allocation2 + $0x8] sm:$0xff] %v2335_v0 }
  0x98 PF: > { %v434_v1 = vld [vmem:[%s2646_s9 + $0x1c8] sm:$0xff]  ;;  %v436_v5 = vld [vmem:[%s2646_s9 + $0x1d8] sm:$0xff]  ;;  %v433_v9 = vld [vmem:[%s2646_s9 + $0x1c0] sm:$0xff]  ;;  %s2957_s2 = sld [smem:[#allocation16_spill]] }
  0x99   : > { %v438_v2 = vld [vmem:[%s2646_s9 + $0x1e8] sm:$0xff]  ;;  %v1628_v3 = vmul.f32 -1.442695, %v434_v1  ;;  %v440_v6 = vld [vmem:[%s2646_s9 + $0x1f8] sm:$0xff]  ;;  %v1630_v7 = vmul.f32 -1.442695, %v436_v5 }
  0x9a   : > { %v1632_v4 = vmul.f32 -1.442695, %v438_v2  ;;  %v1634_v8 = vmul.f32 -1.442695, %v440_v6  ;;  %v437_v10 = vld [vmem:[%s2646_s9 + $0x1e0] sm:$0xff]  ;;  %v435_v13 = vld [vmem:[%s2646_s9 + $0x1d0] sm:$0xff] }
  0x9b   : > { %1804 = vpow2.f32 %v1628_v3  ;;  %v1627_v11 = vmul.f32 -1.442695, %v433_v9  ;;  %v1631_v12 = vmul.f32 -1.442695, %v437_v10  ;;  %v439_v14 = vld [vmem:[%s2646_s9 + $0x1f0] sm:$0xff]  ;;  %v426_v17 = vld [vmem:[%s2646_s9 + $0x188] sm:$0xff] }
  0x9c   : > { %1806 = vpow2.f32 %v1632_v4  ;;  %v1629_v15 = vmul.f32 -1.442695, %v435_v13  ;;  %v1633_v16 = vmul.f32 -1.442695, %v439_v14  ;;  %v430_v18 = vld [vmem:[%s2646_s9 + $0x1a8] sm:$0xff]  ;;  %v428_v20 = vld [vmem:[%s2646_s9 + $0x198] sm:$0xff] }
  0x9d   : > { %1808 = vpow2.f32 %v1630_v7  ;;  %v1620_v19 = vmul.f32 -1.442695, %v426_v17  ;;  %v1624_v21 = vmul.f32 -1.442695, %v430_v18  ;;  %v432_v22 = vld [vmem:[%s2646_s9 + $0x1b8] sm:$0xff]  ;;  %v425_v24 = vld [vmem:[%s2646_s9 + $0x180] sm:$0xff] }
  0x9e   : > { %1810 = vpow2.f32 %v1634_v8  ;;  %v1622_v23 = vmul.f32 -1.442695, %v428_v20  ;;  %v429_v25 = vld [vmem:[%s2646_s9 + $0x1a0] sm:$0xff]  ;;  %v1626_v26 = vmul.f32 -1.442695, %v432_v22  ;;  %v427_v27 = vld [vmem:[%s2646_s9 + $0x190] sm:$0xff] }
  0x9f   : > { %1812 = vpow2.f32 %v1627_v11  ;;  %v1619_v28 = vmul.f32 -1.442695, %v425_v24  ;;  %v431_v29 = vld [vmem:[%s2646_s9 + $0x1b0] sm:$0xff]  ;;  %v1623_v30 = vmul.f32 -1.442695, %v429_v25  ;;  %v418_v58 = vld [vmem:[%s2646_s9 + $0x148] sm:$0xff] }
  0xa0   : > { %1814 = vpow2.f32 %v1631_v12  ;;  %v1621_v31 = vmul.f32 -1.442695, %v427_v27  ;;  %v1625_v32 = vmul.f32 -1.442695, %v431_v29  ;;  %v422_v61 = vld [vmem:[%s2646_s9 + $0x168] sm:$0xff]  ;;  %v420_v0 = vld [vmem:[%s2646_s9 + $0x158] sm:$0xff] }
  0xa1   : > { %1816 = vpow2.f32 %v1629_v15  ;;  %v1612_v3 = vmul.f32 -1.442695, %v418_v58  ;;  %v424_v4 = vld [vmem:[%s2646_s9 + $0x178] sm:$0xff]  ;;  %v417_v5 = vld [vmem:[%s2646_s9 + $0x140] sm:$0xff]  ;;  %v1616_v8 = vmul.f32 -1.442695, %v422_v61 }
  0xa2   : > { %1818 = vpow2.f32 %v1633_v16  ;;  %v421_v9 = vld [vmem:[%s2646_s9 + $0x160] sm:$0xff]  ;;  %v1614_v12 = vmul.f32 -1.442695, %v420_v0  ;;  %v419_v13 = vld [vmem:[%s2646_s9 + $0x150] sm:$0xff]  ;;  %v1618_v16 = vmul.f32 -1.442695, %v424_v4 }
  0xa3   : > { %1820 = vpow2.f32 %v1620_v19  ;;  %v2681_v17 = vmul.f32 -1.442695, %v417_v5  ;;  %v1138_v24 = vld [vmem:[%s2637_s21 + $0x1c8] sm:$0xff]  ;;  %p1639_p1 = scmp.ne.s32.totalorder %s2957_s2, 1 }
  0xa4   : > { %1822 = vpow2.f32 %v1624_v21  ;;  %v2683_v21 = vmul.f32 -1.442695, %v421_v9  ;;  %v1142_v29 = vld [vmem:[%s2637_s21 + $0x1e8] sm:$0xff] }
  0xa5   : > { %1824 = vpow2.f32 %v1622_v23 }
  0xa6   : > { %1826 = vpow2.f32 %v1626_v26  ;;  %v2686_v26 = vmul.f32 -1.442695, %v419_v13 }
  0xa7   : > { %1828 = vpow2.f32 %v1619_v28 }
  0xa8   : > { %v1805_v33 = vpop.eup %1804  ;;  %1830 = vpow2.f32 %v1623_v30 }
  0xa9   : > { %v1807_v34 = vpop.eup %1806  ;;  %v690_v35 = vadd.f32 1.0, %v1805_v33  ;;  %1832 = vpow2.f32 %v1621_v31 }
  0xaa   : > { %v1809_v36 = vpop.eup %1808  ;;  %v694_v37 = vadd.f32 1.0, %v1807_v34  ;;  %1834 = vpow2.f32 %v1625_v32 }
  0xab   : > { %v1811_v38 = vpop.eup %1810  ;;  %1836 = vrcp.f32 %v690_v35  ;;  %v692_v39 = vadd.f32 1.0, %v1809_v36  ;;  %v1140_v35 = vld [vmem:[%s2637_s21 + $0x1d8] sm:$0xff] }
  0xac   : > { %v1813_v40 = vpop.eup %1812  ;;  %1838 = vrcp.f32 %v694_v37  ;;  %v696_v41 = vadd.f32 1.0, %v1811_v38 }
  0xad   : > { %v1815_v42 = vpop.eup %1814  ;;  %1840 = vrcp.f32 %v692_v39  ;;  %v689_v43 = vadd.f32 1.0, %v1813_v40 }
  0xae   : > { %v1817_v44 = vpop.eup %1816  ;;  %1842 = vrcp.f32 %v696_v41  ;;  %v693_v45 = vadd.f32 1.0, %v1815_v42 }
  0xaf   : > { %v1819_v46 = vpop.eup %1818  ;;  %1844 = vrcp.f32 %v689_v43  ;;  %v691_v47 = vadd.f32 1.0, %v1817_v44 }
  0xb0   : > { %v1821_v48 = vpop.eup %1820  ;;  %1846 = vrcp.f32 %v693_v45  ;;  %v695_v49 = vadd.f32 1.0, %v1819_v46 }
  0xb1   : > { %v1823_v50 = vpop.eup %1822  ;;  %1848 = vrcp.f32 %v691_v47  ;;  %v682_v51 = vadd.f32 1.0, %v1821_v48 }
  0xb2   : > { %v1825_v52 = vpop.eup %1824  ;;  %1850 = vrcp.f32 %v695_v49  ;;  %v686_v53 = vadd.f32 1.0, %v1823_v50  ;;  %v1144_v50 = vld [vmem:[%s2637_s21 + $0x1f8] sm:$0xff] }
  0xb3   : > { %v1827_v54 = vpop.eup %1826  ;;  %1852 = vrcp.f32 %v682_v51  ;;  %v684_v55 = vadd.f32 1.0, %v1825_v52 }
  0xb4   : > { %v1829_v56 = vpop.eup %1828  ;;  %1854 = vrcp.f32 %v686_v53  ;;  %v688_v57 = vadd.f32 1.0, %v1827_v54 }
  0xb5   : > { %v1831_v59 = vpop.eup %1830  ;;  %1856 = vrcp.f32 %v684_v55  ;;  %v681_v60 = vadd.f32 1.0, %v1829_v56 }
  0xb6   : > { %v1833_v62 = vpop.eup %1832  ;;  %1858 = vrcp.f32 %v688_v57  ;;  %v685_v63 = vadd.f32 1.0, %v1831_v59  ;;  %v1137_v57 = vld [vmem:[%s2637_s21 + $0x1c0] sm:$0xff] }
  0xb7   : > { %v1835_v1 = vpop.eup %1834  ;;  %1860 = vrcp.f32 %v681_v60  ;;  %v683_v2 = vadd.f32 1.0, %v1833_v62  ;;  %v1141_v62 = vld [vmem:[%s2637_s21 + $0x1e0] sm:$0xff] }
  0xb8   : > { %v1837_v6 = vpop.eup %1836  ;;  %1862 = vrcp.f32 %v685_v63  ;;  %v687_v7 = vadd.f32 1.0, %v1835_v1 }
  0xb9   : > { %v1839_v10 = vpop.eup %1838  ;;  %v882_v11 = vmul.f32 1.2, %v1837_v6  ;;  %1864 = vrcp.f32 %v683_v2  ;;  %v1139_v6 = vld [vmem:[%s2637_s21 + $0x1d0] sm:$0xff] }
  0xba   : > { %v1841_v14 = vpop.eup %1840  ;;  %v886_v15 = vmul.f32 1.2, %v1839_v10  ;;  %1866 = vrcp.f32 %v687_v7  ;;  %v1143_v10 = vld [vmem:[%s2637_s21 + $0x1f0] sm:$0xff] }
  0xbb   : > { %v1843_v18 = vpop.eup %1842  ;;  %v946_v19 = vadd.f32 -0.1, %v882_v11  ;;  %v884_v20 = vmul.f32 1.2, %v1841_v14  ;;  %1868 = vpow2.f32 %v1612_v3 }
  0xbc   : > { %v1845_v22 = vpop.eup %1844  ;;  %v950_v23 = vadd.f32 -0.1, %v886_v15  ;;  %v888_v25 = vmul.f32 1.2, %v1843_v18  ;;  %1870 = vpow2.f32 %v1616_v8 }
  0xbd   : > { %v1847_v27 = vpop.eup %1846  ;;  %v1010_v28 = vmax.f32 %v946_v19, 0.0  ;;  %v948_v30 = vadd.f32 -0.1, %v884_v20  ;;  %v881_v31 = vmul.f32 1.2, %v1845_v22  ;;  %1872 = vpow2.f32 %v1614_v12 }
  0xbe   : > { %v1849_v32 = vpop.eup %1848  ;;  %v1014_v33 = vmax.f32 %v950_v23, 0.0  ;;  %v952_v34 = vadd.f32 -0.1, %v888_v25  ;;  %v885_v36 = vmul.f32 1.2, %v1847_v27  ;;  %1874 = vpow2.f32 %v1618_v16 }
  0xbf   : > { %v1851_v37 = vpop.eup %1850  ;;  %v1074_v38 = vmin.f32 %v1010_v28, 1.0  ;;  %v1012_v39 = vmax.f32 %v948_v30, 0.0  ;;  %v945_v40 = vadd.f32 -0.1, %v881_v31  ;;  %v883_v41 = vmul.f32 1.2, %v1849_v32 }
  0xc0   : > { %v1853_v42 = vpop.eup %1852  ;;  %v1078_v43 = vmin.f32 %v1014_v33, 1.0  ;;  %v1016_v44 = vmax.f32 %v952_v34, 0.0  ;;  %v949_v45 = vadd.f32 -0.1, %v885_v36  ;;  %v887_v46 = vmul.f32 1.2, %v1851_v37 }
  0xc1   : > { %v1855_v47 = vpop.eup %1854  ;;  %v1202_v48 = vmul.f32 %v1138_v24, %v1074_v38  ;;  %v1076_v49 = vmin.f32 %v1012_v39, 1.0  ;;  %v1009_v51 = vmax.f32 %v945_v40, 0.0  ;;  %v947_v52 = vadd.f32 -0.1, %v883_v41  ;;  %v1134_v39 = vld [vmem:[%s2637_s21 + $0x1a8] sm:$0xff] }
  0xc2   : > { %v1857_v53 = vpop.eup %1856  ;;  %v1206_v54 = vmul.f32 %v1142_v29, %v1078_v43  ;;  %v1080_v55 = vmin.f32 %v1016_v44, 1.0  ;;  %v1013_v56 = vmax.f32 %v949_v45, 0.0  ;;  %v951_v58 = vadd.f32 -0.1, %v887_v46  ;;  %v1130_v29 = vld [vmem:[%s2637_s21 + $0x188] sm:$0xff] }
  0xc3   : > { %v1859_v59 = vpop.eup %1858  ;;  %v1204_v60 = vmul.f32 %v1140_v35, %v1076_v49  ;;  %v1073_v61 = vmin.f32 %v1009_v51, 1.0  ;;  %v1011_v63 = vmax.f32 %v947_v52, 0.0  ;;  %v874_v0 = vmul.f32 1.2, %v1853_v42 }
  0xc4   : > { %v1861_v1 = vpop.eup %1860  ;;  %v1238_v2 = vpack.c.bf16 %v1206_v54, %v1202_v48  ;;  %v1208_v3 = vmul.f32 %v1144_v50, %v1080_v55  ;;  %v1077_v4 = vmin.f32 %v1013_v56, 1.0  ;;  %v1015_v5 = vmax.f32 %v951_v58, 0.0  ;;  %v1136_v48 = vld [vmem:[%s2637_s21 + $0x1b8] sm:$0xff] }
  0xc5   : > { %v1863_v7 = vpop.eup %1862  ;;  %v1201_v8 = vmul.f32 %v1137_v57, %v1073_v61  ;;  %v1075_v9 = vmin.f32 %v1011_v63, 1.0  ;;  %v878_v11 = vmul.f32 1.2, %v1855_v47  ;;  %v938_v12 = vadd.f32 -0.1, %v874_v0  ;;  %v1132_v47 = vld [vmem:[%s2637_s21 + $0x198] sm:$0xff] }
  0xc6   : > { %v1865_v13 = vpop.eup %1864  ;;  %1267 = vmatprep.subr.bf16.mxu0 %v1238_v2  ;;  %v1240_v14 = vpack.c.bf16 %v1208_v3, %v1204_v60  ;;  %v1205_v15 = vmul.f32 %v1141_v62, %v1077_v4  ;;  %v1079_v16 = vmin.f32 %v1015_v5, 1.0  ;;  %v876_v18 = vmul.f32 1.2, %v1857_v53  ;;  %v1129_v57 = vld [vmem:[%s2637_s21 + $0x180] sm:$0xff]  ;;  %v1131_v3 = vld [vmem:[%s2637_s21 + $0x190] sm:$0xff] }
  0xc7   : > { %v1867_v19 = vpop.eup %1866  ;;  %v1203_v20 = vmul.f32 %v1139_v6, %v1075_v9  ;;  %v942_v22 = vadd.f32 -0.1, %v878_v11  ;;  %v1002_v23 = vmax.f32 %v938_v12, 0.0  ;;  %v880_v24 = vmul.f32 1.2, %v1859_v59  ;;  %v1133_v61 = vld [vmem:[%s2637_s21 + $0x1a0] sm:$0xff] }
  0xc8   : > { %v1869_v25 = vpop.eup %1868  ;;  %1308 = vmatprep.subr.bf16.mxu1 %v1240_v14  ;;  %v1237_v27 = vpack.c.bf16 %v1205_v15, %v1201_v8  ;;  %v1207_v28 = vmul.f32 %v1143_v10, %v1079_v16  ;;  %v940_v30 = vadd.f32 -0.1, %v876_v18  ;;  %v873_v31 = vmul.f32 1.2, %v1861_v1  ;;  %v423_v8 = vld [vmem:[%s2646_s9 + $0x170] sm:$0xff]  ;;  %v414_v18 = vld [vmem:[%s2646_s9 + $0x128] sm:$0xff] }
  0xc9   : > { %v1871_v32 = vpop.eup %1870  ;;  %v1006_v33 = vmax.f32 %v942_v22, 0.0  ;;  %v1066_v34 = vmin.f32 %v1002_v23, 1.0  ;;  %v944_v35 = vadd.f32 -0.1, %v880_v24  ;;  %v877_v36 = vmul.f32 1.2, %v1863_v7 }
  0xca   : > { %v1873_v37 = vpop.eup %1872  ;;  %1268 = vmatpush1.bf16.xpose.msra.mxu0 %v1237_v27  ;;  %v1239_v38 = vpack.c.bf16 %v1207_v28, %v1203_v20  ;;  %v1004_v40 = vmax.f32 %v940_v30, 0.0  ;;  %v937_v41 = vadd.f32 -0.1, %v873_v31  ;;  %v875_v42 = vmul.f32 1.2, %v1865_v13  ;;  %v1135_v11 = vld [vmem:[%s2637_s21 + $0x1b0] sm:$0xff] }
  0xcb   : > { %v1875_v43 = vpop.eup %1874  ;;  %v1070_v44 = vmin.f32 %v1006_v33, 1.0  ;;  %v1194_v45 = vmul.f32 %v1130_v29, %v1066_v34  ;;  %v1008_v46 = vmax.f32 %v944_v35, 0.0  ;;  %v941_v49 = vadd.f32 -0.1, %v877_v36  ;;  %v410_v13 = vld [vmem:[%s2646_s9 + $0x108] sm:$0xff]  ;;  %v412_v22 = vld [vmem:[%s2646_s9 + $0x118] sm:$0xff] }
  0xcc   : > { %1309 = vmatpush1.bf16.xpose.msra.mxu1 %v1239_v38  ;;  %v1068_v50 = vmin.f32 %v1004_v40, 1.0  ;;  %v1001_v51 = vmax.f32 %v937_v41, 0.0  ;;  %v879_v52 = vmul.f32 1.2, %v1867_v19  ;;  %v939_v53 = vadd.f32 -0.1, %v875_v42 }
  0xcd   : > { %v1198_v54 = vmul.f32 %v1134_v39, %v1070_v44  ;;  %v1072_v55 = vmin.f32 %v1008_v46, 1.0  ;;  %v1005_v56 = vmax.f32 %v941_v49, 0.0  ;;  %v674_v58 = vadd.f32 1.0, %v1869_v25  ;;  %v416_v25 = vld [vmem:[%s2646_s9 + $0x138] sm:$0xff]  ;;  %v409_v28 = vld [vmem:[%s2646_s9 + $0x100] sm:$0xff]  ;;  %v415_v34 = vld [vmem:[%s2646_s9 + $0x130] sm:$0xff] }
  0xce   : > { %v1196_v59 = vmul.f32 %v1132_v47, %v1068_v50  ;;  %v1065_v60 = vmin.f32 %v1001_v51, 1.0  ;;  %v943_v62 = vadd.f32 -0.1, %v879_v52  ;;  %v1003_v63 = vmax.f32 %v939_v53, 0.0  ;;  %v413_v30 = vld [vmem:[%s2646_s9 + $0x120] sm:$0xff]  ;;  %v402_v35 = vld [vmem:[%s2646_s9 + $0xc8] sm:$0xff] }
  0xcf   : > { %v1234_v0 = vpack.c.bf16 %v1198_v54, %v1194_v45  ;;  %v1200_v1 = vmul.f32 %v1136_v48, %v1072_v55  ;;  %v1069_v2 = vmin.f32 %v1005_v56, 1.0  ;;  %v678_v4 = vadd.f32 1.0, %v1871_v32  ;;  %v411_v32 = vld [vmem:[%s2646_s9 + $0x110] sm:$0xff]  ;;  %v404_v39 = vld [vmem:[%s2646_s9 + $0xd8] sm:$0xff] }
  0xd0   : > { %v1193_v5 = vmul.f32 %v1129_v57, %v1065_v60  ;;  %v1007_v6 = vmax.f32 %v943_v62, 0.0  ;;  %v1067_v7 = vmin.f32 %v1003_v63, 1.0  ;;  %1876 = vrcp.f32 %v674_v58  ;;  %v408_v42 = vld [vmem:[%s2646_s9 + $0xf8] sm:$0xff]  ;;  %v1122_v60 = vld [vmem:[%s2637_s21 + $0x148] sm:$0xff] }
  0xd1   : > { %1269 = vmatprep.subr.bf16.mxu0 %v1234_v0  ;;  %v1236_v9 = vpack.c.bf16 %v1200_v1, %v1196_v59  ;;  %v1197_v10 = vmul.f32 %v1133_v61, %v1069_v2  ;;  %1878 = vrcp.f32 %v678_v4  ;;  %v676_v12 = vadd.f32 1.0, %v1873_v37  ;;  %v406_v37 = vld [vmem:[%s2646_s9 + $0xe8] sm:$0xff] }
  0xd2   : > { %v1071_v14 = vmin.f32 %v1007_v6, 1.0  ;;  %v1195_v15 = vmul.f32 %v1131_v3, %v1067_v7  ;;  %v680_v16 = vadd.f32 1.0, %v1875_v43  ;;  %1880 = vpow2.f32 %v2681_v17  ;;  %v1126_v1 = vld [vmem:[%s2637_s21 + $0x168] sm:$0xff] }
  0xd3   : > { %1310 = vmatprep.subr.bf16.mxu1 %v1236_v9  ;;  %v1233_v19 = vpack.c.bf16 %v1197_v10, %v1193_v5  ;;  %1882 = vrcp.f32 %v676_v12  ;;  %v1617_v20 = vmul.f32 -1.442695, %v423_v8  ;;  %v1604_v24 = vmul.f32 -1.442695, %v410_v13 }
  0xd4   : > { %v1199_v23 = vmul.f32 %v1135_v11, %v1071_v14  ;;  %1884 = vrcp.f32 %v680_v16  ;;  %v1608_v27 = vmul.f32 -1.442695, %v414_v18  ;;  %v1606_v29 = vmul.f32 -1.442695, %v412_v22  ;;  %v1124_v11 = vld [vmem:[%s2637_s21 + $0x158] sm:$0xff] }
  0xd5   : > { %1270 = vmatpush1.bf16.xpose.msra.mxu0 %v1233_v19  ;;  %1886 = vpow2.f32 %v2683_v21  ;;  %v1610_v31 = vmul.f32 -1.442695, %v416_v25  ;;  %v1603_v33 = vmul.f32 -1.442695, %v409_v28  ;;  %v1607_v21 = vmul.f32 -1.442695, %v413_v30 }
  0xd6   : > { %v1235_v17 = vpack.c.bf16 %v1199_v23, %v1195_v15  ;;  %1888 = vpow2.f32 %v2686_v26  ;;  %v1605_v36 = vmul.f32 -1.442695, %v411_v32  ;;  %v1609_v38 = vmul.f32 -1.442695, %v415_v34  ;;  %v1128_v16 = vld [vmem:[%s2637_s21 + $0x178] sm:$0xff]  ;;  %v401_v32 = vld [vmem:[%s2646_s9 + $0xc0] sm:$0xff] }
  0xd7   : > { %1890 = vpow2.f32 %v1617_v20  ;;  %v1596_v26 = vmul.f32 -1.442695, %v402_v35  ;;  %v1600_v41 = vmul.f32 -1.442695, %v406_v37  ;;  %v1598_v47 = vmul.f32 -1.442695, %v404_v39 }
  0xd8   : > { %1311 = vmatpush1.bf16.xpose.msra.mxu1 %v1235_v17  ;;  %1892 = vpow2.f32 %v1604_v24  ;;  %v1602_v51 = vmul.f32 -1.442695, %v408_v42  ;;  %v1595_v39 = vmul.f32 -1.442695, %v401_v32  ;;  %v403_v42 = vld [vmem:[%s2646_s9 + $0xd0] sm:$0xff] }
  0xd9   : > { %1894 = vpow2.f32 %v1608_v27 }
  0xda   : > { %1896 = vpow2.f32 %v1606_v29 }
  0xdb   : > { %1898 = vpow2.f32 %v1610_v31 }
  0xdc   : > { %1900 = vpow2.f32 %v1603_v33 }
  0xdd   : > { %v1877_v40 = vpop.eup %1876  ;;  %1902 = vpow2.f32 %v1607_v21 }
  0xde   : > { %v1879_v43 = vpop.eup %1878  ;;  %v866_v44 = vmul.f32 1.2, %v1877_v40  ;;  %1904 = vpow2.f32 %v1605_v36 }
  0xdf   : > { %v1881_v45 = vpop.eup %1880  ;;  %v870_v46 = vmul.f32 1.2, %v1879_v43  ;;  %1906 = vpow2.f32 %v1609_v38 }
  0xe0   : > { %v1883_v48 = vpop.eup %1882  ;;  %v930_v49 = vadd.f32 -0.1, %v866_v44  ;;  %v673_v50 = vadd.f32 1.0, %v1881_v45  ;;  %1908 = vpow2.f32 %v1596_v26  ;;  %v405_v26 = vld [vmem:[%s2646_s9 + $0xe0] sm:$0xff]  ;;  %v407_v45 = vld [vmem:[%s2646_s9 + $0xf0] sm:$0xff] }
  0xe1   : > { %v1885_v52 = vpop.eup %1884  ;;  %v934_v53 = vadd.f32 -0.1, %v870_v46  ;;  %v868_v54 = vmul.f32 1.2, %v1883_v48  ;;  %1910 = vpow2.f32 %v1600_v41  ;;  %v1599_v48 = vmul.f32 -1.442695, %v405_v26 }
  0xe2   : > { %v1887_v55 = vpop.eup %1886  ;;  %v994_v56 = vmax.f32 %v930_v49, 0.0  ;;  %v872_v57 = vmul.f32 1.2, %v1885_v52  ;;  %1912 = vrcp.f32 %v673_v50  ;;  %v394_v49 = vld [vmem:[%s2646_s9 + $0x88] sm:$0xff] }
  0xe3   : > { %v1889_v58 = vpop.eup %1888  ;;  %v998_v59 = vmax.f32 %v934_v53, 0.0  ;;  %v932_v61 = vadd.f32 -0.1, %v868_v54  ;;  %v677_v62 = vadd.f32 1.0, %v1887_v55  ;;  %1914 = vpow2.f32 %v1598_v47  ;;  %v398_v54 = vld [vmem:[%s2646_s9 + $0xa8] sm:$0xff] }
  0xe4   : > { %v1891_v63 = vpop.eup %1890  ;;  %v1058_v0 = vmin.f32 %v994_v56, 1.0  ;;  %v936_v2 = vadd.f32 -0.1, %v872_v57  ;;  %v675_v3 = vadd.f32 1.0, %v1889_v58  ;;  %1916 = vpow2.f32 %v1602_v51 }
  0xe5   : > { %v1893_v4 = vpop.eup %1892  ;;  %v1062_v5 = vmin.f32 %v998_v59, 1.0  ;;  %v996_v6 = vmax.f32 %v932_v61, 0.0  ;;  %1918 = vrcp.f32 %v677_v62  ;;  %v679_v7 = vadd.f32 1.0, %v1891_v63 }
  0xe6   : > { %v1895_v8 = vpop.eup %1894  ;;  %v1186_v9 = vmul.f32 %v1122_v60, %v1058_v0  ;;  %v1000_v10 = vmax.f32 %v936_v2, 0.0  ;;  %1920 = vrcp.f32 %v675_v3  ;;  %v666_v12 = vadd.f32 1.0, %v1893_v4  ;;  %v1121_v60 = vld [vmem:[%s2637_s21 + $0x140] sm:$0xff] }
  0xe7   : > { %v1897_v13 = vpop.eup %1896  ;;  %v1190_v14 = vmul.f32 %v1126_v1, %v1062_v5  ;;  %v1060_v15 = vmin.f32 %v996_v6, 1.0  ;;  %1922 = vrcp.f32 %v679_v7  ;;  %v670_v18 = vadd.f32 1.0, %v1895_v8  ;;  %v1125_v5 = vld [vmem:[%s2637_s21 + $0x160] sm:$0xff] }
  0xe8   : > { %v1899_v19 = vpop.eup %1898  ;;  %v1064_v20 = vmin.f32 %v1000_v10, 1.0  ;;  %1924 = vrcp.f32 %v666_v12  ;;  %v668_v22 = vadd.f32 1.0, %v1897_v13  ;;  %v1597_v53 = vmul.f32 -1.442695, %v403_v42 }
  0xe9   : > { %v1901_v23 = vpop.eup %1900  ;;  %v1230_v24 = vpack.c.bf16 %v1190_v14, %v1186_v9  ;;  %v1188_v25 = vmul.f32 %v1124_v11, %v1060_v15  ;;  %1926 = vrcp.f32 %v670_v18  ;;  %v672_v27 = vadd.f32 1.0, %v1899_v19  ;;  %v1123_v11 = vld [vmem:[%s2637_s21 + $0x150] sm:$0xff] }
  0xea   : > { %v1903_v28 = vpop.eup %1902  ;;  %v1192_v17 = vmul.f32 %v1128_v16, %v1064_v20  ;;  %1928 = vrcp.f32 %v668_v22  ;;  %v665_v29 = vadd.f32 1.0, %v1901_v23  ;;  %v1601_v57 = vmul.f32 -1.442695, %v407_v45  ;;  %v1127_v16 = vld [vmem:[%s2637_s21 + $0x170] sm:$0xff] }
  0xeb   : > { %v1905_v30 = vpop.eup %1904  ;;  %1271 = vmatprep.subr.bf16.mxu0 %v1230_v24  ;;  %1930 = vrcp.f32 %v672_v27  ;;  %v669_v31 = vadd.f32 1.0, %v1903_v28  ;;  %v2730_v62 = vmul.f32 -1.442695, %v394_v49  ;;  %v2732_v2 = vmul.f32 -1.442695, %v398_v54 }
  0xec   : > { %v1907_v33 = vpop.eup %1906  ;;  %v1232_v34 = vpack.c.bf16 %v1192_v17, %v1188_v25  ;;  %1932 = vrcp.f32 %v665_v29  ;;  %v667_v21 = vadd.f32 1.0, %v1905_v30  ;;  %v1114_v25 = vld [vmem:[%s2637_s21 + $0x108] sm:$0xff] }
  0xed   : > { %v1909_v35 = vpop.eup %1908  ;;  %1934 = vrcp.f32 %v669_v31  ;;  %v671_v36 = vadd.f32 1.0, %v1907_v33 }
  0xee   : > { %v1911_v37 = vpop.eup %1910  ;;  %1312 = vmatprep.subr.bf16.mxu1 %v1232_v34  ;;  %1936 = vrcp.f32 %v667_v21  ;;  %v658_v38 = vadd.f32 1.0, %v1909_v35 }
  0xef   : > { %v1913_v40 = vpop.eup %1912  ;;  %1938 = vrcp.f32 %v671_v36  ;;  %v662_v41 = vadd.f32 1.0, %v1911_v37  ;;  %v1800_v36 = vld [vmem:[%s2629_s6 + $0x4] ss:$16 sps:$4 sm:$0xff]  }
  0xf0   : > { %v1915_v43 = vpop.eup %1914  ;;  %v865_v44 = vmul.f32 1.2, %v1913_v40  ;;  %1940 = vrcp.f32 %v658_v38  ;;  %1299 = vmatprep.mubr.bf16.mxu0 %v1800_v36 }
  0xf1   : > { %v1917_v46 = vpop.eup %1916  ;;  %1942 = vrcp.f32 %v662_v41  ;;  %v660_v47 = vadd.f32 1.0, %v1915_v43 }
  0xf2   : > { %v1919_v50 = vpop.eup %1918  ;;  %v929_v51 = vadd.f32 -0.1, %v865_v44  ;;  %v664_v52 = vadd.f32 1.0, %v1917_v46  ;;  %1944 = vpow2.f32 %v1595_v39  ;;  %v1118_v39 = vld [vmem:[%s2637_s21 + $0x128] sm:$0xff] }
  0xf3   : > { %v1921_v55 = vpop.eup %1920  ;;  %v869_v56 = vmul.f32 1.2, %v1919_v50  ;;  %1946 = vrcp.f32 %v660_v47  ;;  %v1116_v47 = vld [vmem:[%s2637_s21 + $0x118] sm:$0xff] }
  0xf4   : > { %v1923_v58 = vpop.eup %1922  ;;  %v993_v59 = vmax.f32 %v929_v51, 0.0  ;;  %v867_v61 = vmul.f32 1.2, %v1921_v55  ;;  %1948 = vrcp.f32 %v664_v52  ;;  %v1120_v52 = vld [vmem:[%s2637_s21 + $0x138] sm:$0xff] }
  0xf5   : > { %v1925_v63 = vpop.eup %1924  ;;  %v933_v0 = vadd.f32 -0.1, %v869_v56  ;;  %v871_v1 = vmul.f32 1.2, %v1923_v58  ;;  %1950 = vpow2.f32 %v1599_v48  ;;  %v1803_v48 = vld [vmem:[%s2629_s6 + $0xc] ss:$16 sps:$4 sm:$0xff]  }
  0xf6   : > { %v1927_v3 = vpop.eup %1926  ;;  %v1057_v4 = vmin.f32 %v993_v59, 1.0  ;;  %v931_v6 = vadd.f32 -0.1, %v867_v61  ;;  %v858_v7 = vmul.f32 1.2, %v1925_v63  ;;  %1952 = vpow2.f32 %v1597_v53  ;;  %1340 = vmatprep.mubr.bf16.mxu1 %v1803_v48 }
  0xf7   : > { %v1929_v8 = vpop.eup %1928  ;;  %v997_v9 = vmax.f32 %v933_v0, 0.0  ;;  %v935_v10 = vadd.f32 -0.1, %v871_v1  ;;  %v862_v12 = vmul.f32 1.2, %v1927_v3  ;;  %1954 = vpow2.f32 %v1601_v57 }
  0xf8   : > { %v1931_v13 = vpop.eup %1930  ;;  %v1185_v14 = vmul.f32 %v1121_v60, %v1057_v4  ;;  %v995_v15 = vmax.f32 %v931_v6, 0.0  ;;  %v922_v18 = vadd.f32 -0.1, %v858_v7  ;;  %v860_v19 = vmul.f32 1.2, %v1929_v8  ;;  %v1113_v6 = vld [vmem:[%s2637_s21 + $0x100] sm:$0xff] }
  0xf9   : > { %v1933_v20 = vpop.eup %1932  ;;  %v1061_v22 = vmin.f32 %v997_v9, 1.0  ;;  %v999_v23 = vmax.f32 %v935_v10, 0.0  ;;  %v926_v24 = vadd.f32 -0.1, %v862_v12  ;;  %v864_v27 = vmul.f32 1.2, %v1931_v13 }
  0xfa   : > { %v1935_v28 = vpop.eup %1934  ;;  %v1059_v17 = vmin.f32 %v995_v15, 1.0  ;;  %v986_v29 = vmax.f32 %v922_v18, 0.0  ;;  %v924_v30 = vadd.f32 -0.1, %v860_v19  ;;  %v857_v31 = vmul.f32 1.2, %v1933_v20 }
  0xfb   : > { %v1937_v32 = vpop.eup %1936  ;;  %v1189_v33 = vmul.f32 %v1125_v5, %v1061_v22  ;;  %v1063_v34 = vmin.f32 %v999_v23, 1.0  ;;  %v990_v21 = vmax.f32 %v926_v24, 0.0  ;;  %v928_v35 = vadd.f32 -0.1, %v864_v27  ;;  %v1117_v7 = vld [vmem:[%s2637_s21 + $0x120] sm:$0xff]  ;;  %v1115_v27 = vld [vmem:[%s2637_s21 + $0x110] sm:$0xff] }
  0xfc   : > { %v1939_v37 = vpop.eup %1938  ;;  %v1187_v38 = vmul.f32 %v1123_v11, %v1059_v17  ;;  %v1050_v26 = vmin.f32 %v986_v29, 1.0  ;;  %v988_v40 = vmax.f32 %v924_v30, 0.0  ;;  %v861_v41 = vmul.f32 1.2, %v1935_v28  ;;  %v1119_v28 = vld [vmem:[%s2637_s21 + $0x130] sm:$0xff] }
  0xfd   : > { %v1941_v42 = vpop.eup %1940  ;;  %v1229_v43 = vpack.c.bf16 %v1189_v33, %v1185_v14  ;;  %v1191_v44 = vmul.f32 %v1127_v16, %v1063_v34  ;;  %v1054_v45 = vmin.f32 %v990_v21, 1.0  ;;  %v992_v46 = vmax.f32 %v928_v35, 0.0  ;;  %v1106_v35 = vld [vmem:[%s2637_s21 + $0xc8] sm:$0xff] }
  0xfe   : > { %v1943_v49 = vpop.eup %1942  ;;  %v1178_v50 = vmul.f32 %v1114_v25, %v1050_v26  ;;  %v1052_v51 = vmin.f32 %v988_v40, 1.0  ;;  %v921_v53 = vadd.f32 -0.1, %v857_v31  ;;  %v925_v54 = vadd.f32 -0.1, %v861_v41  ;;  %v1110_v26 = vld [vmem:[%s2637_s21 + $0xe8] sm:$0xff] }
  0xff   : > { %v1945_v55 = vpop.eup %1944  ;;  %1272 = vmatpush1.bf16.xpose.msra.mxu0 %v1229_v43  ;;  %v1231_v56 = vpack.c.bf16 %v1191_v44, %v1187_v38  ;;  %v1182_v57 = vmul.f32 %v1118_v39, %v1054_v45  ;;  %v1056_v58 = vmin.f32 %v992_v46, 1.0  ;;  %v859_v59 = vmul.f32 1.2, %v1937_v32  ;;  %v1108_v43 = vld [vmem:[%s2637_s21 + $0xd8] sm:$0xff] }
 0x100   : > { %v1947_v60 = vpop.eup %1946  ;;  %v1180_v61 = vmul.f32 %v1116_v47, %v1052_v51  ;;  %v985_v63 = vmax.f32 %v921_v53, 0.0  ;;  %v989_v0 = vmax.f32 %v925_v54, 0.0  ;;  %v863_v1 = vmul.f32 1.2, %v1939_v37  ;;  %v396_v45 = vld [vmem:[%s2646_s9 + $0x98] sm:$0xff] }
 0x101   : > { %v1949_v3 = vpop.eup %1948  ;;  %1313 = vmatpush1.bf16.xpose.msra.mxu1 %v1231_v56  ;;  %v1226_v4 = vpack.c.bf16 %v1182_v57, %v1178_v50  ;;  %v1184_v5 = vmul.f32 %v1120_v52, %v1056_v58  ;;  %v923_v8 = vadd.f32 -0.1, %v859_v59  ;;  %v850_v9 = vmul.f32 1.2, %v1941_v42  ;;  %v400_v50 = vld [vmem:[%s2646_s9 + $0xb8] sm:$0xff]  ;;  %v397_v59 = vld [vmem:[%s2646_s9 + $0xa0] sm:$0xff] }
 0x102   : > { %v1951_v10 = vpop.eup %1950  ;;  %v1049_v11 = vmin.f32 %v985_v63, 1.0  ;;  %v1053_v12 = vmin.f32 %v989_v0, 1.0  ;;  %v927_v13 = vadd.f32 -0.1, %v863_v1  ;;  %v854_v14 = vmul.f32 1.2, %v1943_v49 }
 0x103   : > { %v1953_v15 = vpop.eup %1952  ;;  %1273 = vmatprep.subr.bf16.mxu0 %v1226_v4  ;;  %v1228_v16 = vpack.c.bf16 %v1184_v5, %v1180_v61  ;;  %v987_v18 = vmax.f32 %v923_v8, 0.0  ;;  %v914_v19 = vadd.f32 -0.1, %v850_v9  ;;  %v852_v20 = vmul.f32 1.2, %v1947_v60  ;;  %v1112_v53 = vld [vmem:[%s2637_s21 + $0xf8] sm:$0xff] }
 0x104   : > { %v1955_v22 = vpop.eup %1954  ;;  %v1177_v23 = vmul.f32 %v1113_v6, %v1049_v11  ;;  %v1181_v24 = vmul.f32 %v1117_v7, %v1053_v12  ;;  %v991_v25 = vmax.f32 %v927_v13, 0.0  ;;  %v918_v17 = vadd.f32 -0.1, %v854_v14  ;;  %v395_v63 = vld [vmem:[%s2646_s9 + $0x90] sm:$0xff]  ;;  %v386_v5 = vld [vmem:[%s2646_s9 + $0x48] sm:$0xff]  ;;  %v392_v11 = vld [vmem:[%s2646_s9 + $0x78] sm:$0xff] }
 0x105   : > { %1314 = vmatprep.subr.bf16.mxu1 %v1228_v16  ;;  %v1051_v29 = vmin.f32 %v987_v18, 1.0  ;;  %v978_v30 = vmax.f32 %v914_v19, 0.0  ;;  %v856_v31 = vmul.f32 1.2, %v1949_v3  ;;  %v916_v32 = vadd.f32 -0.1, %v852_v20 }
 0x106   : > { %v1225_v33 = vpack.c.bf16 %v1181_v24, %v1177_v23  ;;  %v1055_v34 = vmin.f32 %v991_v25, 1.0  ;;  %v982_v21 = vmax.f32 %v918_v17, 0.0  ;;  %v657_v36 = vadd.f32 1.0, %v1945_v55  ;;  %v393_v55 = vld [vmem:[%s2646_s9 + $0x80] sm:$0xff]  ;;  %v399_v3 = vld [vmem:[%s2646_s9 + $0xb0] sm:$0xff]  ;;  %v390_v8 = vld [vmem:[%s2646_s9 + $0x68] sm:$0xff] }
 0x107   : > { %v1179_v37 = vmul.f32 %v1115_v27, %v1051_v29  ;;  %v1042_v38 = vmin.f32 %v978_v30, 1.0  ;;  %v920_v39 = vadd.f32 -0.1, %v856_v31  ;;  %v980_v40 = vmax.f32 %v916_v32, 0.0  ;;  %v385_v13 = vld [vmem:[%s2646_s9 + $0x40] sm:$0xff]  ;;  %v387_v16 = vld [vmem:[%s2646_s9 + $0x50] sm:$0xff] }
 0x108   : > { %1274 = vmatpush1.bf16.xpose.msra.mxu0 %v1225_v33  ;;  %v1183_v41 = vmul.f32 %v1119_v28, %v1055_v34  ;;  %v1046_v42 = vmin.f32 %v982_v21, 1.0  ;;  %v661_v44 = vadd.f32 1.0, %v1951_v10  ;;  %1956 = vrcp.f32 %v657_v36  ;;  %v388_v10 = vld [vmem:[%s2646_s9 + $0x58] sm:$0xff]  ;;  %v389_v14 = vld [vmem:[%s2646_s9 + $0x60] sm:$0xff]  ;;  %v391_v17 = vld [vmem:[%s2646_s9 + $0x70] sm:$0xff] }
 0x109   : > { %v1170_v46 = vmul.f32 %v1106_v35, %v1042_v38  ;;  %v984_v47 = vmax.f32 %v920_v39, 0.0  ;;  %v1044_v48 = vmin.f32 %v980_v40, 1.0  ;;  %v659_v49 = vadd.f32 1.0, %v1953_v15  ;;  %v1105_v35 = vld [vmem:[%s2637_s21 + $0xc0] sm:$0xff] }
 0x10a   : > { %v1227_v51 = vpack.c.bf16 %v1183_v41, %v1179_v37  ;;  %v1174_v52 = vmul.f32 %v1110_v26, %v1046_v42  ;;  %1958 = vrcp.f32 %v661_v44  ;;  %v663_v54 = vadd.f32 1.0, %v1955_v22  ;;  %v1109_v44 = vld [vmem:[%s2637_s21 + $0xe0] sm:$0xff] }
 0x10b   : > { %v1048_v56 = vmin.f32 %v984_v47, 1.0  ;;  %v1172_v57 = vmul.f32 %v1108_v43, %v1044_v48  ;;  %1960 = vrcp.f32 %v659_v49  ;;  %v1590_v58 = vmul.f32 -1.442695, %v396_v45 }
 0x10c   : > { %1315 = vmatpush1.bf16.xpose.msra.mxu1 %v1227_v51  ;;  %v1222_v60 = vpack.c.bf16 %v1174_v52, %v1170_v46  ;;  %1962 = vrcp.f32 %v663_v54  ;;  %v1594_v61 = vmul.f32 -1.442695, %v400_v50  ;;  %v1587_v1 = vmul.f32 -1.442695, %v393_v55  ;;  %v1107_v51 = vld [vmem:[%s2637_s21 + $0xd0] sm:$0xff] }
 0x10d   : > { %v1176_v0 = vmul.f32 %v1112_v53, %v1048_v56  ;;  %1964 = vpow2.f32 %v2730_v62  ;;  %v1591_v4 = vmul.f32 -1.442695, %v397_v59  ;;  %v1589_v7 = vmul.f32 -1.442695, %v395_v63  ;;  %v1111_v54 = vld [vmem:[%s2637_s21 + $0xf0] sm:$0xff] }
 0x10e   : > { %1275 = vmatprep.subr.bf16.mxu0 %v1222_v60  ;;  %1966 = vpow2.f32 %v2732_v2  ;;  %v1593_v9 = vmul.f32 -1.442695, %v399_v3  ;;  %v1580_v62 = vmul.f32 -1.442695, %v386_v5  ;;  %v1584_v12 = vmul.f32 -1.442695, %v390_v8 }
 0x10f   : > { %v1224_v6 = vpack.c.bf16 %v1176_v0, %v1172_v57  ;;  %1968 = vpow2.f32 %v1590_v58  ;;  %v1582_v2 = vmul.f32 -1.442695, %v388_v10  ;;  %v1586_v15 = vmul.f32 -1.442695, %v392_v11 }
 0x110   : > { %1970 = vpow2.f32 %v1594_v61  ;;  %v1579_v19 = vmul.f32 -1.442695, %v385_v13  ;;  %v1583_v22 = vmul.f32 -1.442695, %v389_v14  ;;  %v1581_v24 = vmul.f32 -1.442695, %v387_v16 }
 0x111   : > { %1316 = vmatprep.subr.bf16.mxu1 %v1224_v6  ;;  %1972 = vpow2.f32 %v1587_v1  ;;  %v1585_v38 = vmul.f32 -1.442695, %v391_v17  ;;  %v382_v16 = vld [vmem:[%s2646_s9 + $0x28] sm:$0xff] }
 0x112   : > { %1974 = vpow2.f32 %v1591_v4 }
 0x113   : > { %1976 = vpow2.f32 %v1589_v7 }
 0x114   : > { %1978 = vpow2.f32 %v1593_v9 }
 0x115   : > { %v1957_v18 = vpop.eup %1956  ;;  %1980 = vpow2.f32 %v1580_v62 }
 0x116   : > { %v849_v20 = vmul.f32 1.2, %v1957_v18  ;;  %1982 = vpow2.f32 %v1584_v12 }
 0x117   : > { %v1959_v23 = vpop.eup %1958  ;;  %1984 = vpow2.f32 %v1582_v2  ;;  %v378_v2 = vld [vmem:[%s2646_s9 + $0x8] sm:$0xff] }
 0x118   : > { %v1961_v25 = vpop.eup %1960  ;;  %v853_v27 = vmul.f32 1.2, %v1959_v23  ;;  %v913_v28 = vadd.f32 -0.1, %v849_v20  ;;  %1986 = vpow2.f32 %v1586_v15  ;;  %v380_v20 = vld [vmem:[%s2646_s9 + $0x18] sm:$0xff] }
 0x119   : > { %v1963_v29 = vpop.eup %1962  ;;  %v851_v30 = vmul.f32 1.2, %v1961_v25  ;;  %1988 = vpow2.f32 %v1579_v19  ;;  %v1572_v23 = vmul.f32 -1.442695, %v378_v2  ;;  %v1576_v25 = vmul.f32 -1.442695, %v382_v16 }
 0x11a   : > { %v1965_v31 = vpop.eup %1964  ;;  %v917_v32 = vadd.f32 -0.1, %v853_v27  ;;  %v977_v33 = vmax.f32 %v913_v28, 0.0  ;;  %v855_v34 = vmul.f32 1.2, %v1963_v29  ;;  %1990 = vpow2.f32 %v1583_v22  ;;  %v384_v27 = vld [vmem:[%s2646_s9 + $0x38] sm:$0xff] }
 0x11b   : > { %v1967_v21 = vpop.eup %1966  ;;  %v915_v36 = vadd.f32 -0.1, %v851_v30  ;;  %v650_v37 = vadd.f32 1.0, %v1965_v31  ;;  %1992 = vpow2.f32 %v1581_v24  ;;  %v1574_v29 = vmul.f32 -1.442695, %v380_v20  ;;  %v377_v30 = vld [vmem:[%s2646_s9] sm:$0xff] }
 0x11c   : > { %v1969_v26 = vpop.eup %1968  ;;  %v981_v39 = vmax.f32 %v917_v32, 0.0  ;;  %v1041_v40 = vmin.f32 %v977_v33, 1.0  ;;  %v919_v41 = vadd.f32 -0.1, %v855_v34  ;;  %v654_v42 = vadd.f32 1.0, %v1967_v21  ;;  %v381_v33 = vld [vmem:[%s2646_s9 + $0x20] sm:$0xff] }
 0x11d   : > { %v1971_v43 = vpop.eup %1970  ;;  %v979_v45 = vmax.f32 %v915_v36, 0.0  ;;  %1994 = vrcp.f32 %v650_v37  ;;  %v652_v46 = vadd.f32 1.0, %v1969_v26  ;;  %v1578_v36 = vmul.f32 -1.442695, %v384_v27  ;;  %v1101_v16 = vld [vmem:[%s2637_s21 + $0xa0] sm:$0xff] }
 0x11e   : > { %v1973_v47 = vpop.eup %1972  ;;  %v1045_v48 = vmin.f32 %v981_v39, 1.0  ;;  %v1169_v49 = vmul.f32 %v1105_v35, %v1041_v40  ;;  %v983_v50 = vmax.f32 %v919_v41, 0.0  ;;  %1996 = vrcp.f32 %v654_v42  ;;  %v1098_v42 = vld [vmem:[%s2637_s21 + $0x88] sm:$0xff] }
 0x11f   : > { %v1975_v52 = vpop.eup %1974  ;;  %v1043_v53 = vmin.f32 %v979_v45, 1.0  ;;  %v656_v55 = vadd.f32 1.0, %v1971_v43  ;;  %1998 = vrcp.f32 %v652_v46  ;;  %v649_v56 = vadd.f32 1.0, %v1973_v47  ;;  %v1102_v47 = vld [vmem:[%s2637_s21 + $0xa8] sm:$0xff] }
 0x120   : > { %v1977_v57 = vpop.eup %1976  ;;  %v1173_v58 = vmul.f32 %v1109_v44, %v1045_v48  ;;  %v1047_v59 = vmin.f32 %v983_v50, 1.0  ;;  %v653_v60 = vadd.f32 1.0, %v1975_v52  ;;  %2000 = vpow2.f32 %v1585_v38 }
 0x121   : > { %v1979_v61 = vpop.eup %1978  ;;  %v1171_v63 = vmul.f32 %v1107_v51, %v1043_v53  ;;  %2002 = vrcp.f32 %v656_v55  ;;  %v651_v0 = vadd.f32 1.0, %v1977_v57  ;;  %v2777_v39 = vmul.f32 -1.442695, %v377_v30  ;;  %v1100_v57 = vld [vmem:[%s2637_s21 + $0x98] sm:$0xff] }
 0x122   : > { %v1981_v1 = vpop.eup %1980  ;;  %v1221_v3 = vpack.c.bf16 %v1173_v58, %v1169_v49  ;;  %v1175_v4 = vmul.f32 %v1111_v54, %v1047_v59  ;;  %2004 = vrcp.f32 %v649_v56  ;;  %v655_v5 = vadd.f32 1.0, %v1979_v61 }
 0x123   : > { %v1983_v6 = vpop.eup %1982  ;;  %2006 = vrcp.f32 %v653_v60  ;;  %v642_v7 = vadd.f32 1.0, %v1981_v1  ;;  %v2781_v49 = vmul.f32 -1.442695, %v381_v33 }
 0x124   : > { %v1985_v8 = vpop.eup %1984  ;;  %1276 = vmatpush1.bf16.xpose.msra.mxu0 %v1221_v3  ;;  %v1223_v9 = vpack.c.bf16 %v1175_v4, %v1171_v63  ;;  %2008 = vrcp.f32 %v651_v0  ;;  %v646_v10 = vadd.f32 1.0, %v1983_v6 }
 0x125   : > { %v1987_v62 = vpop.eup %1986  ;;  %2010 = vrcp.f32 %v655_v5  ;;  %v644_v11 = vadd.f32 1.0, %v1985_v8  ;;  %v1104_v5 = vld [vmem:[%s2637_s21 + $0xb8] sm:$0xff] }
 0x126   : > { %v1989_v12 = vpop.eup %1988  ;;  %1317 = vmatpush1.bf16.xpose.msra.mxu1 %v1223_v9  ;;  %2012 = vrcp.f32 %v642_v7  ;;  %v648_v13 = vadd.f32 1.0, %v1987_v62 }
 0x127   : > { %v1991_v14 = vpop.eup %1990  ;;  %2014 = vrcp.f32 %v646_v10  ;;  %v641_v15 = vadd.f32 1.0, %v1989_v12  ;;  %v1097_v12 = vld [vmem:[%s2637_s21 + $0x80] sm:$0xff] }
 0x128   : > { %v1993_v18 = vpop.eup %1992  ;;  %2016 = vrcp.f32 %v644_v11  ;;  %v645_v19 = vadd.f32 1.0, %v1991_v14 }
 0x129   : > { %2018 = vrcp.f32 %v648_v13  ;;  %v643_v22 = vadd.f32 1.0, %v1993_v18 }
 0x12a   : > { %v1995_v24 = vpop.eup %1994  ;;  %2020 = vrcp.f32 %v641_v15 }
 0x12b   : > { %v1997_v28 = vpop.eup %1996  ;;  %v842_v17 = vmul.f32 1.2, %v1995_v24  ;;  %2022 = vrcp.f32 %v645_v19  ;;  %v1099_v24 = vld [vmem:[%s2637_s21 + $0x90] sm:$0xff] }
 0x12c   : > { %v1999_v31 = vpop.eup %1998  ;;  %v846_v32 = vmul.f32 1.2, %v1997_v28  ;;  %2024 = vrcp.f32 %v643_v22 }
 0x12d   : > { %v2001_v34 = vpop.eup %2000  ;;  %v906_v21 = vadd.f32 -0.1, %v842_v17  ;;  %v844_v35 = vmul.f32 1.2, %v1999_v31  ;;  %2026 = vpow2.f32 %v1572_v23 }
 0x12e   : > { %v2003_v37 = vpop.eup %2002  ;;  %v910_v38 = vadd.f32 -0.1, %v846_v32  ;;  %v647_v26 = vadd.f32 1.0, %v2001_v34  ;;  %2028 = vpow2.f32 %v1576_v25 }
 0x12f   : > { %v2005_v40 = vpop.eup %2004  ;;  %v970_v41 = vmax.f32 %v906_v21, 0.0  ;;  %v848_v43 = vmul.f32 1.2, %v2003_v37  ;;  %v908_v44 = vadd.f32 -0.1, %v844_v35  ;;  %2030 = vpow2.f32 %v1574_v29  ;;  %v1103_v21 = vld [vmem:[%s2637_s21 + $0xb0] sm:$0xff] }
 0x130   : > { %v2007_v45 = vpop.eup %2006  ;;  %v974_v46 = vmax.f32 %v910_v38, 0.0  ;;  %v841_v48 = vmul.f32 1.2, %v2005_v40  ;;  %2032 = vrcp.f32 %v647_v26  ;;  %v1090_v40 = vld [vmem:[%s2637_s21 + $0x48] sm:$0xff] }
 0x131   : > { %v2009_v50 = vpop.eup %2008  ;;  %v1034_v51 = vmin.f32 %v970_v41, 1.0  ;;  %v912_v52 = vadd.f32 -0.1, %v848_v43  ;;  %v972_v53 = vmax.f32 %v908_v44, 0.0  ;;  %v845_v54 = vmul.f32 1.2, %v2007_v45 }
 0x132   : > { %v2011_v55 = vpop.eup %2010  ;;  %v1038_v56 = vmin.f32 %v974_v46, 1.0  ;;  %v905_v58 = vadd.f32 -0.1, %v841_v48  ;;  %v843_v59 = vmul.f32 1.2, %v2009_v50  ;;  %2034 = vpow2.f32 %v1578_v36 }
 0x133   : > { %v2013_v60 = vpop.eup %2012  ;;  %v1162_v61 = vmul.f32 %v1098_v42, %v1034_v51  ;;  %v976_v63 = vmax.f32 %v912_v52, 0.0  ;;  %v1036_v0 = vmin.f32 %v972_v53, 1.0  ;;  %v909_v1 = vadd.f32 -0.1, %v845_v54  ;;  %v1094_v51 = vld [vmem:[%s2637_s21 + $0x68] sm:$0xff] }
 0x134   : > { %v2015_v3 = vpop.eup %2014  ;;  %v1166_v4 = vmul.f32 %v1102_v47, %v1038_v56  ;;  %v969_v6 = vmax.f32 %v905_v58, 0.0  ;;  %v847_v7 = vmul.f32 1.2, %v2011_v55  ;;  %v907_v8 = vadd.f32 -0.1, %v843_v59  ;;  %v1092_v58 = vld [vmem:[%s2637_s21 + $0x58] sm:$0xff] }
 0x135   : > { %v2017_v9 = vpop.eup %2016  ;;  %v1040_v10 = vmin.f32 %v976_v63, 1.0  ;;  %v1164_v62 = vmul.f32 %v1100_v57, %v1036_v0  ;;  %v973_v11 = vmax.f32 %v909_v1, 0.0  ;;  %v834_v13 = vmul.f32 1.2, %v2013_v60 }
 0x136   : > { %v2019_v2 = vpop.eup %2018  ;;  %v1218_v14 = vpack.c.bf16 %v1166_v4, %v1162_v61  ;;  %v1033_v15 = vmin.f32 %v969_v6, 1.0  ;;  %v911_v18 = vadd.f32 -0.1, %v847_v7  ;;  %v971_v19 = vmax.f32 %v907_v8, 0.0 }
 0x137   : > { %v2021_v20 = vpop.eup %2020  ;;  %v1168_v22 = vmul.f32 %v1104_v5, %v1040_v10  ;;  %v1037_v23 = vmin.f32 %v973_v11, 1.0  ;;  %v838_v25 = vmul.f32 1.2, %v2015_v3  ;;  %v898_v27 = vadd.f32 -0.1, %v834_v13  ;;  %v1096_v5 = vld [vmem:[%s2637_s21 + $0x78] sm:$0xff] }
 0x138   : > { %v2023_v28 = vpop.eup %2022  ;;  %1277 = vmatprep.subr.bf16.mxu0 %v1218_v14  ;;  %v1161_v17 = vmul.f32 %v1097_v12, %v1033_v15  ;;  %v975_v29 = vmax.f32 %v911_v18, 0.0  ;;  %v1035_v30 = vmin.f32 %v971_v19, 1.0  ;;  %v836_v31 = vmul.f32 1.2, %v2017_v9  ;;  %v1089_v11 = vld [vmem:[%s2637_s21 + $0x40] sm:$0xff] }
 0x139   : > { %v2025_v32 = vpop.eup %2024  ;;  %v1220_v33 = vpack.c.bf16 %v1168_v22, %v1164_v62  ;;  %v1165_v34 = vmul.f32 %v1101_v16, %v1037_v23  ;;  %v902_v35 = vadd.f32 -0.1, %v838_v25  ;;  %v962_v36 = vmax.f32 %v898_v27, 0.0  ;;  %v1093_v14 = vld [vmem:[%s2637_s21 + $0x60] sm:$0xff]  ;;  %v379_v23 = vld [vmem:[%s2646_s9 + $0x10] sm:$0xff] }
 0x13a   : > { %v2027_v37 = vpop.eup %2026  ;;  %v1039_v38 = vmin.f32 %v975_v29, 1.0  ;;  %v1163_v26 = vmul.f32 %v1099_v24, %v1035_v30  ;;  %v840_v41 = vmul.f32 1.2, %v2019_v2  ;;  %v900_v42 = vadd.f32 -0.1, %v836_v31  ;;  %v1095_v31 = vld [vmem:[%s2637_s21 + $0x70] sm:$0xff] }
 0x13b   : > { %v2029_v43 = vpop.eup %2028  ;;  %1318 = vmatprep.subr.bf16.mxu1 %v1220_v33  ;;  %v1217_v44 = vpack.c.bf16 %v1165_v34, %v1161_v17  ;;  %v966_v45 = vmax.f32 %v902_v35, 0.0  ;;  %v1026_v46 = vmin.f32 %v962_v36, 1.0  ;;  %v833_v47 = vmul.f32 1.2, %v2021_v20  ;;  %v1091_v20 = vld [vmem:[%s2637_s21 + $0x50] sm:$0xff] }
 0x13c   : > { %v2031_v48 = vpop.eup %2030  ;;  %v1167_v50 = vmul.f32 %v1103_v21, %v1039_v38  ;;  %v904_v52 = vadd.f32 -0.1, %v840_v41  ;;  %v964_v53 = vmax.f32 %v900_v42, 0.0  ;;  %v837_v54 = vmul.f32 1.2, %v2023_v28  ;;  %v383_v17 = vld [vmem:[%s2646_s9 + $0x30] sm:$0xff] }
 0x13d   : > { %v2033_v55 = vpop.eup %2032  ;;  %1278 = vmatpush1.bf16.xpose.msra.mxu0 %v1217_v44  ;;  %v1030_v56 = vmin.f32 %v966_v45, 1.0  ;;  %v1154_v57 = vmul.f32 %v1090_v40, %v1026_v46  ;;  %v897_v59 = vadd.f32 -0.1, %v833_v47  ;;  %v835_v60 = vmul.f32 1.2, %v2025_v32 }
 0x13e   : > { %v1219_v61 = vpack.c.bf16 %v1167_v50, %v1163_v26  ;;  %v968_v63 = vmax.f32 %v904_v52, 0.0  ;;  %v1028_v0 = vmin.f32 %v964_v53, 1.0  ;;  %v901_v1 = vadd.f32 -0.1, %v837_v54 }
 0x13f   : > { %v2035_v3 = vpop.eup %2034  ;;  %v1158_v4 = vmul.f32 %v1094_v51, %v1030_v56  ;;  %v961_v6 = vmax.f32 %v897_v59, 0.0  ;;  %v839_v7 = vmul.f32 1.2, %v2033_v55  ;;  %v899_v8 = vadd.f32 -0.1, %v835_v60  ;;  %v1086_v60 = vld [vmem:[%s2637_s21 + $0x28] sm:$0xff] }
 0x140   : > { %1319 = vmatpush1.bf16.xpose.msra.mxu1 %v1219_v61  ;;  %v1032_v9 = vmin.f32 %v968_v63, 1.0  ;;  %v1156_v10 = vmul.f32 %v1092_v58, %v1028_v0  ;;  %v965_v62 = vmax.f32 %v901_v1, 0.0  ;;  %v634_v12 = vadd.f32 1.0, %v2027_v37 }
 0x141   : > { %v1214_v13 = vpack.c.bf16 %v1158_v4, %v1154_v57  ;;  %v1025_v2 = vmin.f32 %v961_v6, 1.0  ;;  %v903_v15 = vadd.f32 -0.1, %v839_v7  ;;  %v963_v16 = vmax.f32 %v899_v8, 0.0  ;;  %v1084_v4 = vld [vmem:[%s2637_s21 + $0x18] sm:$0xff] }
 0x142   : > { %v1160_v18 = vmul.f32 %v1096_v5, %v1032_v9  ;;  %v1029_v19 = vmin.f32 %v965_v62, 1.0  ;;  %v638_v22 = vadd.f32 1.0, %v2029_v43  ;;  %2036 = vrcp.f32 %v634_v12  ;;  %v1088_v6 = vld [vmem:[%s2637_s21 + $0x38] sm:$0xff] }
 0x143   : > { %1279 = vmatprep.subr.bf16.mxu0 %v1214_v13  ;;  %v1153_v24 = vmul.f32 %v1089_v11, %v1025_v2  ;;  %v967_v25 = vmax.f32 %v903_v15, 0.0  ;;  %v1027_v27 = vmin.f32 %v963_v16, 1.0  ;;  %v636_v28 = vadd.f32 1.0, %v2031_v48 }
 0x144   : > { %v1216_v29 = vpack.c.bf16 %v1160_v18, %v1156_v10  ;;  %v1157_v30 = vmul.f32 %v1093_v14, %v1029_v19  ;;  %2038 = vrcp.f32 %v638_v22  ;;  %v640_v32 = vadd.f32 1.0, %v2035_v3 }
 0x145   : > { %v1031_v33 = vmin.f32 %v967_v25, 1.0  ;;  %v1155_v34 = vmul.f32 %v1091_v20, %v1027_v27  ;;  %2040 = vrcp.f32 %v636_v28  ;;  %v1573_v21 = vmul.f32 -1.442695, %v379_v23  ;;  %v1081_v28 = vld [vmem:[%s2637_s21] sm:$0xff] }
 0x146   : > { %1320 = vmatprep.subr.bf16.mxu1 %v1216_v29  ;;  %v1213_v35 = vpack.c.bf16 %v1157_v30, %v1153_v24  ;;  %2042 = vrcp.f32 %v640_v32  ;;  %v1577_v36 = vmul.f32 -1.442695, %v383_v17  ;;  %v1085_v29 = vld [vmem:[%s2637_s21 + $0x20] sm:$0xff] }
 0x147   : > { %v1159_v37 = vmul.f32 %v1095_v31, %v1031_v33  ;;  %2044 = vpow2.f32 %v2777_v39  ;;  %v1083_v33 = vld [vmem:[%s2637_s21 + $0x10] sm:$0xff] }
 0x148   : > { %1280 = vmatpush1.bf16.xpose.msra.mxu0 %v1213_v35  ;;  %2046 = vpow2.f32 %v2781_v49  ;;  %v1082_v49 = vld [vmem:[%s2637_s21 + $0x8] sm:$0xff] }
 0x149   : > { %v1215_v38 = vpack.c.bf16 %v1159_v37, %v1155_v34  ;;  %2048 = vpow2.f32 %v1573_v21  ;;  %v1087_v37 = vld [vmem:[%s2637_s21 + $0x30] sm:$0xff] }
 0x14a   : > { %2050 = vpow2.f32 %v1577_v36 }
 0x14b   : > { %1321 = vmatpush1.bf16.xpose.msra.mxu1 %v1215_v38 }
 0x14f   : > { %v2037_v26 = vpop.eup %2036 }
 0x150   : > { %v826_v40 = vmul.f32 1.2, %v2037_v26 }
 0x151   : > { %v2039_v41 = vpop.eup %2038 }
 0x152   : > { %v2041_v42 = vpop.eup %2040  ;;  %v830_v43 = vmul.f32 1.2, %v2039_v41  ;;  %v890_v44 = vadd.f32 -0.1, %v826_v40 }
 0x153   : > { %v2043_v45 = vpop.eup %2042  ;;  %v828_v46 = vmul.f32 1.2, %v2041_v42 }
 0x154   : > { %v2045_v47 = vpop.eup %2044  ;;  %v894_v48 = vadd.f32 -0.1, %v830_v43  ;;  %v954_v39 = vmax.f32 %v890_v44, 0.0  ;;  %v832_v50 = vmul.f32 1.2, %v2043_v45 }
 0x155   : > { %v2047_v51 = vpop.eup %2046  ;;  %v892_v52 = vadd.f32 -0.1, %v828_v46  ;;  %v633_v53 = vadd.f32 1.0, %v2045_v47  ;;  %v1798_v43 = vld [vmem:[%s2629_s6] ss:$16 sps:$4 sm:$0xff]  }
 0x156   : > { %v2049_v54 = vpop.eup %2048  ;;  %v958_v55 = vmax.f32 %v894_v48, 0.0  ;;  %v1018_v56 = vmin.f32 %v954_v39, 1.0  ;;  %v896_v57 = vadd.f32 -0.1, %v832_v50  ;;  %v637_v58 = vadd.f32 1.0, %v2047_v51  ;;  %v1241_v47 = vld [vmem:[#allocation2] sm:$0xff] }
 0x157   : > { %v2051_v59 = vpop.eup %2050  ;;  %v956_v61 = vmax.f32 %v892_v52, 0.0  ;;  %2052 = vrcp.f32 %v633_v53  ;;  %v635_v63 = vadd.f32 1.0, %v2049_v54  ;;  %v1801_v44 = vld [vmem:[%s2629_s6 + $0x8] ss:$16 sps:$4 sm:$0xff]  }
 0x158   : > { %v1022_v0 = vmin.f32 %v958_v55, 1.0  ;;  %v1146_v1 = vmul.f32 %v1082_v49, %v1018_v56  ;;  %v960_v3 = vmax.f32 %v896_v57, 0.0  ;;  %2054 = vrcp.f32 %v637_v58  ;;  %v1242_v53 = vld [vmem:[#allocation2 + $0x8] sm:$0xff] }
 0x159   : > { %v1020_v5 = vmin.f32 %v956_v61, 1.0  ;;  %v639_v7 = vadd.f32 1.0, %v2051_v59  ;;  %2056 = vrcp.f32 %v635_v63 }
 0x15a   : > { %v1150_v8 = vmul.f32 %v1086_v60, %v1022_v0  ;;  %v1024_v9 = vmin.f32 %v960_v3, 1.0 }
 0x15b   : > { %v1148_v10 = vmul.f32 %v1084_v4, %v1020_v5  ;;  %2058 = vrcp.f32 %v639_v7 }
 0x15c   : > { %v1210_v62 = vpack.c.bf16 %v1150_v8, %v1146_v1  ;;  %v1152_v11 = vmul.f32 %v1088_v6, %v1024_v9 }
 0x15e   : > { %1281 = vmatprep.subr.bf16.mxu0 %v1210_v62  ;;  %v1212_v12 = vpack.c.bf16 %v1152_v11, %v1148_v10 }
 0x160   : > { %1322 = vmatprep.subr.bf16.mxu1 %v1212_v12 }
 0x164   : > { %v2053_v13 = vpop.eup %2052 }
 0x165   : > { %v2055_v2 = vpop.eup %2054  ;;  %v825_v14 = vmul.f32 1.2, %v2053_v13 }
 0x166   : > { %v2057_v15 = vpop.eup %2056  ;;  %v829_v16 = vmul.f32 1.2, %v2055_v2 }
 0x167   : > { %v889_v18 = vadd.f32 -0.1, %v825_v14  ;;  %v827_v19 = vmul.f32 1.2, %v2057_v15 }
 0x168   : > { %v2059_v20 = vpop.eup %2058  ;;  %v893_v22 = vadd.f32 -0.1, %v829_v16 }
 0x169   : > { %v953_v23 = vmax.f32 %v889_v18, 0.0  ;;  %v831_v24 = vmul.f32 1.2, %v2059_v20  ;;  %v891_v25 = vadd.f32 -0.1, %v827_v19 }
 0x16a   : > { %v957_v27 = vmax.f32 %v893_v22, 0.0 }
 0x16b   : > { %v1017_v17 = vmin.f32 %v953_v23, 1.0  ;;  %v895_v30 = vadd.f32 -0.1, %v831_v24  ;;  %v955_v31 = vmax.f32 %v891_v25, 0.0 }
 0x16c   : > { %v1021_v32 = vmin.f32 %v957_v27, 1.0 }
 0x16d   : > { %v1145_v34 = vmul.f32 %v1081_v28, %v1017_v17  ;;  %v959_v21 = vmax.f32 %v895_v30, 0.0  ;;  %v1019_v35 = vmin.f32 %v955_v31, 1.0 }
 0x16e   : > { %v1149_v36 = vmul.f32 %v1085_v29, %v1021_v32 }
 0x16f   : > { %v1023_v38 = vmin.f32 %v959_v21, 1.0  ;;  %v1147_v26 = vmul.f32 %v1083_v33, %v1019_v35 }
 0x170   : > { %v1209_v40 = vpack.c.bf16 %v1149_v36, %v1145_v34 }
 0x171   : > { %v1151_v41 = vmul.f32 %v1087_v37, %v1023_v38 }
 0x172   : > { %1282 = vmatpush1.bf16.xpose.msra.mxu0 %v1209_v40 }
 0x173   : > { %v1211_v42 = vpack.c.bf16 %v1151_v41, %v1147_v26 }
 0x175   : > { %1323 = vmatpush1.bf16.xpose.msra.mxu1 %v1211_v42 }
 0x179   : > { %1300 = vmatmul.mubr.bf16.vlgmr.msra.gmra.mxu0 %v1798_v43 }
 0x17c   : > { %1341 = vmatmul.mubr.bf16.vlgmr.msra.gmra.mxu1 %v1801_v44 }
 0x239   : > { %v1301_v45 = vpop.f32.mrf.mxu0 }
 0x23b   : > { %v1303_v46 = vpop.f32.mrf.mxu0 }
 0x23c   : > { %v1342_v48 = vpop.f32.mrf.mxu1 }
 0x23d   : > { %v1343_v39 = vadd.f32 %v1342_v48, %v1301_v45  ;;  %v1304_v50 = vpop.f32.mrf.mxu0 }
 0x23e   : > { %v1344_v51 = vpop.f32.mrf.mxu1 }
 0x23f   : > { %v1349_v49 = vadd.f32 %v1343_v39, %v1241_v47  ;;  %v1306_v52 = vpop.f32.mrf.mxu0 }
 0x240   : > { %v1345_v54 = vpop.f32.mrf.mxu1 }
 0x241   : > { %1351 = vst [vmem:[#allocation2] sm:$0xff] %v1349_v49  ;;  %v1346_v55 = vadd.f32 %v1345_v54, %v1304_v50  ;;  %1356 = sbr.rel (%p1639_p1) target bundleno = 592 (0x250), region = 60 }
 0x242   : > { %v1347_v56 = vpop.f32.mrf.mxu1 }
 0x243   : > { %v1350_v57 = vadd.f32 %v1346_v55, %v1242_v53 }
 0x245   : > { %1352 = vst [vmem:[#allocation2 + $0x8] sm:$0xff] %v1350_v57 }
 0x246   : > { %v1640_v59 = vld [vmem:[%s324_s5] ss:$0 sm:$0xff] }
 0x248   : > { %v1357_v58 = vld [vmem:[#allocation2] sm:$0xff] }
 0x249   : > { %v1366_v61 = vadd.f32 %v1640_v59, %v1357_v58 }
 0x24b   : > { %1368 = vst [vmem:[%s2655_s1] sm:$0xff] %v1366_v61 }
 0x24c   : > { %v1358_v60 = vld [vmem:[#allocation2 + $0x8] sm:$0xff] }
 0x24d   : > { %v1367_v63 = vadd.f32 %v1640_v59, %v1358_v60 }
 0x24f   : > { %1369 = vst [vmem:[%s2655_s1 + $0x8] sm:$0xff] %v1367_v63 }
 0x250 PF: > { %s2958_s29 = sld [smem:[#allocation17_spill]]  ;;  %s1386_s8 = sshll.u32 %s2655_s1, 4  ;;  %s2823_s8 = int_to_ptr.vmem [resolvable:$true] %s1386_s8 }
 0x251   : > { %s2959_s0 = sld [smem:[#allocation26_spill]]  ;;  %s1371_s10 = scalar_lea.sflag [#allocation5], %s2644_s12 }
 0x252   : > { %s2172_s21 = scalar_lea.vmem %s2823_s8, 256  ;;  %p2960_p13 = scmp.ne.s32.totalorder %s2949_s13, 0 }
 0x253   : > { %p2173_p3 = scmp.ne.s32.totalorder %s2823_s8, %s2172_s21  ;;  %s2336_s9 = smov [#allocation11]  }
 0x254   : > { %s2176_s11 = sshll.u32 %s2336_s9, 4  ;;  %s2177_s11 = int_to_ptr.vmem [resolvable:$false] %s2176_s11 }
 0x255   : > { %p2174_p2 = pnand %p2173_p3, %p2960_p13  ;;  %s2178_s5 = scalar_lea.vmem %s2177_s11, 512 }
 0x256   : > { %s1642_s25 = sshll.u32 %s2958_s29, 7  ;;  %p2179_p6 = scmp.lt.s32.totalorder %s2823_s8, %s2177_s11 }
 0x257   : > { %s2820_s27 = scalar_lea.hbm %s2959_s0, %s1642_s25  ;;  %p2175_p11 = pneg %p2174_p2 }
 0x258   : > { %p2180_p5 = scmp.lt.s32.totalorder %s2178_s5, %s2172_s21 }
 0x25a   : > { %p2181_p8 = por %p2180_p5, %p2179_p6 }
 0x25c   : > { %p2182_p0 = pnand %p2181_p8, %p2175_p11 }
 0x25e   : > { %2185 = shalt.err (!%p2182_p0)
}
 0x25f   : > { %s2186_s14 = scalar_lea.hbm %s2820_s27, 256  ;;  %s2190_s2 = scalar_lea.hbm %s2959_s0, 768 }
 0x260   : > { %p2187_p4 = scmp.ne.s32.totalorder %s2820_s27, %s2186_s14  ;;  %p2191_p9 = scmp.lt.s32.totalorder %s2820_s27, %s2959_s0 }
 0x261   : > { %p2192_p12 = scmp.lt.s32.totalorder %s2190_s2, %s2186_s14 }
 0x262   : > { %p2188_p10 = pnand %p2187_p4, %p2960_p13 }
 0x263   : > { %p2193_p1 = por %p2192_p12, %p2191_p9 }
 0x264   : > { %p2189_p7 = pneg %p2188_p10 }
 0x266   : > { %p2194_p3 = pnand %p2193_p1, %p2189_p7 }
 0x268   : > { %2197 = shalt.err (!%p2194_p3)
}
 0x269   : > { %s2337_s4 = smov 128   ;;  %s2338_s6 = smov 384  }
 0x26a   : > { %s2339_s21 = smov 8  }
 0x26b   : > { %1656 = dma.vmem_to_hbm [thread:$0]  (%p2960_p13), %s2823_s8, 256, %s2820_s27, %s1371_s10, %s2337_s4, %s2338_s6, %s2339_s21  }
 0x26c PF: > { %p1676_p2 = scmp.ge.s32.totalorder %s2324_s28, 2  ;;  %s1401_s9 = sand.u32 1, %s2272_s15  }
 0x26d   : > { %p2961_p11 = scmp.ne.s32.totalorder %s2950_s3, 0  ;;  %s1402_s11 = scalar_lea.sflag [#allocation5], %s1401_s9 }
 0x26f   : > { %p1672_p6 = pnand %p1676_p2, %p2961_p11 }
 0x271   : > { %p1673_p5 = pneg %p1672_p6 }
 0x273   : > { %2267 = dma.done.wait (%p1673_p5), %s1402_s11, 256  }
 0x274   : > { %2269 = vsyncadd (%p1673_p5), %s1402_s11, 4294967040  ;;  %s26_s28 = sadd.s32 1, %s2324_s28   ;;  %s2963_s25 = sld [smem:[#allocation18_spill]] }
 0x275   : > { %p2853_p8 = scmp.ge.s32.totalorder %s26_s28, 8   ;;  %s2964_s13 = sld [smem:[#allocation20_spill]] }
 0x276   : > { %s2965_s27 = sld [smem:[#allocation21_spill]]  ;;  %s2966_s15 = smov %s2276_s16 }
 0x277   : > { %s2967_s16 = smov %s2280_s17  ;;  %s2968_s17 = smov %s2579_s18 }
 0x278   : > { %s2969_s18 = smov %s2288_s19  ;;  %s2970_s19 = smov %s2292_s20 }
 0x279   : > { %s2971_s20 = smov %s2584_s24  ;;  %s2972_s21 = smov %s2300_s22 }
 0x27a   : > { %s2973_s22 = smov %s2304_s23  ;;  %s2974_s23 = smov %s2571_s7 }
 0x27b   : > { %s2975_s24 = smov %s2316_s26  ;;  %s2976_s26 = smov %s2964_s13 }
 0x27c   :  { %25 = sbr.rel (!%p2853_p8) target bundleno = 20 (0x14), region = 126 }
 0x281   :  { %1407 = vsyncpa [#allocation4], 1 }
 0x282   :  { %1409 = vsyncpa [#allocation4 + $0x1], 1 }
 0x283   :  { %1410 = vsyncpa [#allocation7], 1 }
 0x284   :  { %1412 = vsyncpa [#allocation7 + $0x1], 1 }
 0x285   :  { %1413 = vsyncpa [#allocation10], 1 }
 0x286   :  { %1415 = vsyncpa [#allocation10 + $0x1], 1 }
 0x287   :  { %1416 = vsyncpa [#allocation5], 1 }
 0x288   :  { %1418 = vsyncpa [#allocation5 + $0x1], 1 }

</bundles_post_ra>
